<compile_context>
chip_gen: v5e
topology: v5e:2x2
jax: 0.10.0
libtpu: 0.0.40
codegen_flags: <defaults>
</compile_context>

<pallas_src>
import functools

import numpy as np
import jax
import jax.numpy as jnp
from jax.experimental import pallas as pl
from jax.experimental.pallas import tpu as pltpu

EPS = 1e-5
_LANE = 128  # left halo of the row-padded scratch -> all scratch *stores* lane-aligned


def _bilinear_matrix(n_in, n_out, dtype=jnp.float32):
    """Interpolation matrix for Upsample(scale=2, mode='bilinear', align_corners=True)."""
    if n_in == 1:
        return jnp.ones((n_out, 1), dtype)
    out_idx = jnp.arange(n_out, dtype=jnp.float32)
    src = out_idx * (n_in - 1) / (n_out - 1)
    i0 = jnp.clip(jnp.floor(src).astype(jnp.int32), 0, n_in - 2)
    frac = src - i0.astype(jnp.float32)
    m = jnp.zeros((n_out, n_in), dtype)
    m = m.at[jnp.arange(n_out), i0].add(1.0 - frac)
    m = m.at[jnp.arange(n_out), i0 + 1].add(frac)
    return m


def _decoder_kernel(x_ref, skip_ref, ut_ref, s1_ref, b1_ref, w1_ref,
                    s2_ref, b2_ref, w2_ref, ws_ref, bias_ref,
                    ml_ref, mr_ref, out_ref, buf1, buf2, *, H, W):
    HW = H * W
    RP = W + 1                       # zero rows "below" the image

    ml = ml_ref[...]                 # (1, HW) bf16: 0 on the x == 0     column, else 1
    mr = mr_ref[...]                 # (1, HW) bf16: 0 on the x == W - 1 column, else 1

    def conv3x3(y, w_ref, buf):
        """3x3 same-conv of y:(C, HW) f32 as one im2col matmul on the MXU."""
        C = buf.shape[0]
        # Re-zero only the halo regions every step (cheap; interior is fully
        # overwritten below, and per-step zeroing stays correct under megacore).
        buf[:, 0:_LANE] = jnp.zeros((C, _LANE), jnp.bfloat16)
        buf[:, _LANE + HW:_LANE + HW + RP] = jnp.zeros((C, RP), jnp.bfloat16)
        # Lane-aligned interior write of the bf16 activation.
        buf[:, _LANE:_LANE + HW] = y.astype(jnp.bfloat16)

        taps = []
        for k in range(9):
            dy, dx = k // 3 - 1, k % 3 - 1
            start = _LANE + dy * W + dx
            t = buf[:, start:start + HW]          # shifted window (lane-rotated load)
            if dx == -1:
                t = t * ml                        # kill wrap into previous row
            elif dx == 1:
                t = t * mr                        # kill wrap into next row
            taps.append(t)
        patches = jnp.concatenate(taps, axis=0)   # (9*C, HW) bf16 im2col buffer
        return jnp.dot(w_ref[...], patches, preferred_element_type=jnp.float32)

    # ---- fused bilinear x2 upsample: one matmul with the Kronecker interp matrix ----
    x_up = jnp.dot(x_ref[0].astype(jnp.bfloat16), ut_ref[...],
                   preferred_element_type=jnp.float32)            # (Cin, HW) f32
    xcat = jnp.concatenate([x_up, skip_ref[0]], axis=0)           # (Ccat, HW) f32

    # ---- BN1 (eval, folded) + ReLU -> conv1 (conv1 bias folded into BN2 bias) ----
    y1 = jnp.maximum(xcat * s1_ref[...] + b1_ref[...], 0.0)
    h = conv3x3(y1, w1_ref, buf1)                                  # (Cout, HW)

    # ---- BN2 + ReLU -> conv2 ----
    y2 = jnp.maximum(h * s2_ref[...] + b2_ref[...], 0.0)
    h = conv3x3(y2, w2_ref, buf2)                                  # (Cout, HW)

    # ---- 1x1 shortcut conv + folded (conv2 + shortcut) bias + residual add ----
    sc = jnp.dot(ws_ref[...], xcat.astype(jnp.bfloat16),
                 preferred_element_type=jnp.float32)               # (Cout, HW)
    out_ref[0] = (h + sc + bias_ref[...]).astype(out_ref.dtype)


def decoder_block_forward(x_input, skip, p):
    """DecoderBlock.forward: upsample(x) -> concat([x, skip], ch) -> ResidualBlock (NCHW)."""
    N, Cin, Hin, Win = x_input.shape
    Cskip, H, W = skip.shape[1], skip.shape[2], skip.shape[3]
    Cout = p["w1"].shape[0]
    Ccat = Cin + Cskip
    HW, HWin = H * W, Hin * Win
    assert W + 1 <= _LANE

    x_flat = x_input.reshape(N, Cin, HWin).astype(jnp.float32)
    skip_flat = skip.reshape(N, Cskip, HW).astype(jnp.float32)

    # x2 bilinear (align_corners=True) upsample operator over flattened spatial dims.
    ut = jnp.kron(_bilinear_matrix(Hin, H), _bilinear_matrix(Win, W)).T.astype(jnp.bfloat16)

    # Fold eval-mode BatchNorm into per-channel scale/bias; fold conv1 bias into BN2 bias.
    inv1 = p["g1"] / jnp.sqrt(p["rv1"] + EPS)
    inv2 = p["g2"] / jnp.sqrt(p["rv2"] + EPS)
    s1 = inv1.reshape(Ccat, 1)
    b1 = (p["be1"] - p["rm1"] * inv1).reshape(Ccat, 1)
    s2 = inv2.reshape(Cout, 1)
    b2 = (p["be2"] - p["rm2"] * inv2 + inv2 * p["b1"]).reshape(Cout, 1)

    # Conv weights packed for im2col (tap-major, channel-minor columns), bf16 for the MXU.
    w1 = jnp.transpose(p["w1"], (0, 2, 3, 1)).reshape(Cout, 9 * Ccat).astype(jnp.bfloat16)
    w2 = jnp.transpose(p["w2"], (0, 2, 3, 1)).reshape(Cout, 9 * Cout).astype(jnp.bfloat16)
    ws = p["ws"].reshape(Cout, Ccat).astype(jnp.bfloat16)
    bias = (p["b2"] + p["bs"]).reshape(Cout, 1)             # conv2 bias + shortcut bias

    # Column-wrap masks for the dx = -1 / +1 taps of the flattened-spatial conv.
    col = jnp.arange(HW, dtype=jnp.int32) % W
    mask_l = (col != 0).astype(jnp.bfloat16).reshape(1, HW)
    mask_r = (col != (W - 1)).astype(jnp.bfloat16).reshape(1, HW)

    operands = (x_flat, skip_flat, ut, s1, b1, w1, s2, b2, w2, ws, bias, mask_l, mask_r)

    in_specs = [pl.BlockSpec((1, Cin, HWin), lambda n: (n, 0, 0)),
                pl.BlockSpec((1, Cskip, HW), lambda n: (n, 0, 0))]
    for a in operands[2:]:
        in_specs.append(pl.BlockSpec(a.shape, lambda n, _nd=a.ndim: (0,) * _nd))

    buf_w = _LANE + HW + W + 1
    out = pl.pallas_call(
        functools.partial(_decoder_kernel, H=H, W=W),
        out_shape=jax.ShapeDtypeStruct((N, Cout, HW), jnp.float32),
        grid_spec=pltpu.PrefetchScalarGridSpec(
            num_scalar_prefetch=0,
            grid=(N,),
            in_specs=in_specs,
            out_specs=pl.BlockSpec((1, Cout, HW), lambda n: (n, 0, 0)),
            scratch_shapes=[pltpu.VMEM((Ccat, buf_w), jnp.bfloat16),
                            pltpu.VMEM((Cout, buf_w), jnp.bfloat16)],
        ),
        compiler_params=pltpu.CompilerParams(
            dimension_semantics=("parallel",)),
    )(*operands)
    return out.reshape(N, Cout, H, W)                        # already NCHW


def init_params(key, in_channels, out_channels):
    """Deterministic synthetic parameters matching the module's __init__ shapes."""
    ccat = in_channels + out_channels
    ks = jax.random.split(key, 14)

    def u(k, shape, scale):
        return jax.random.uniform(k, shape, jnp.float32, -scale, scale)

    p = {
        # BatchNorm2d(ccat)
        "g1": 1.0 + 0.1 * jax.random.normal(ks[0], (ccat,)),
        "be1": 0.1 * jax.random.normal(ks[1], (ccat,)),
        "rm1": 0.1 * jax.random.normal(ks[2], (ccat,)),
        "rv1": 1.0 + 0.2 * jnp.abs(jax.random.normal(ks[3], (ccat,))),
        # Conv2d(ccat, out, 3, pad=1)
        "w1": u(ks[4], (out_channels, ccat, 3, 3), 1.0 / np.sqrt(ccat * 9)),
        "b1": u(ks[5], (out_channels,), 0.1),
        # BatchNorm2d(out)
        "g2": 1.0 + 0.1 * jax.random.normal(ks[6], (out_channels,)),
        "be2": 0.1 * jax.random.normal(ks[7], (out_channels,)),
        "rm2": 0.1 * jax.random.normal(ks[8], (out_channels,)),
        "rv2": 1.0 + 0.2 * jnp.abs(jax.random.normal(ks[9], (out_channels,))),
        # Conv2d(out, out, 3, pad=1)
        "w2": u(ks[10], (out_channels, out_channels, 3, 3), 1.0 / np.sqrt(out_channels * 9)),
        "b2": u(ks[11], (out_channels,), 0.1),
        # Conv2d(ccat, out, 1) shortcut
        "ws": u(ks[12], (out_channels, ccat, 1, 1), 1.0 / np.sqrt(ccat)),
        "bs": u(ks[13], (out_channels,), 0.1),
    }
    return {k: v.astype(jnp.float32) for k, v in p.items()}


def ref_forward(x_input, skip, p):
    """Pure-JAX (XLA, f32) reference of the same forward pass, NCHW."""
    Hin, Win = x_input.shape[2], x_input.shape[3]
    H, W = skip.shape[2], skip.shape[3]
    Mh = _bilinear_matrix(Hin, H)
    Mw = _bilinear_matrix(Win, W)
    x_up = jnp.einsum('Hh,nchw,Ww->ncHW', Mh, x_input, Mw,
                      precision=jax.lax.Precision.HIGHEST)
    x = jnp.concatenate([x_up, skip], axis=1)

    def bn(t, g, b, rm, rv):
        inv = g / jnp.sqrt(rv + EPS)
        return t * inv[None, :, None, None] + (b - rm * inv)[None, :, None, None]

    def conv(t, w, b, pad):
        y = jax.lax.conv_general_dilated(
            t, w, (1, 1), ((pad, pad), (pad, pad)),
            dimension_numbers=('NCHW', 'OIHW', 'NCHW'),
            precision=jax.lax.Precision.HIGHEST)
        return y + b[None, :, None, None]

    h = jax.nn.relu(bn(x, p["g1"], p["be1"], p["rm1"], p["rv1"]))
    h = conv(h, p["w1"], p["b1"], 1)
    h = jax.nn.relu(bn(h, p["g2"], p["be2"], p["rm2"], p["rv2"]))
    h = conv(h, p["w2"], p["b2"], 1)
    sc = conv(x, p["ws"], p["bs"], 0)
    return h + sc


if __name__ == "__main__":
    key = jax.random.PRNGKey(0)
    in_channels, out_channels = 8, 4
    N, Hin, Win = 2, 8, 8

    kx, ksk, kp = jax.random.split(key, 3)
    x_input = jax.random.normal(kx, (N, in_channels, Hin, Win), jnp.float32)
    skip = jax.random.normal(ksk, (N, out_channels, 2 * Hin, 2 * Win), jnp.float32)
    params = init_params(kp, in_channels, out_channels)

    out = jax.block_until_ready(decoder_block_forward(x_input, skip, params))
    ref = jax.block_until_ready(ref_forward(x_input, skip, params))

    assert out.shape == (N, out_channels, 2 * Hin, 2 * Win), out.shape
    np.testing.assert_allclose(np.asarray(out), np.asarray(ref), rtol=1e-2, atol=1e-2)
    print("KERNEL_OK")
</pallas_src>

<mosaic_0001>
module attributes {stable_mosaic.version = 11 : i64} {
  func.func @_decoder_kernel(%arg0: i32, %arg1: memref<1x8x64xf32, #tpu.memory_space<vmem>>, %arg2: memref<1x4x256xf32, #tpu.memory_space<vmem>>, %arg3: memref<64x256xbf16, #tpu.memory_space<vmem>>, %arg4: memref<12x1xf32, #tpu.memory_space<vmem>>, %arg5: memref<12x1xf32, #tpu.memory_space<vmem>>, %arg6: memref<4x108xbf16, #tpu.memory_space<vmem>>, %arg7: memref<4x1xf32, #tpu.memory_space<vmem>>, %arg8: memref<4x1xf32, #tpu.memory_space<vmem>>, %arg9: memref<4x36xbf16, #tpu.memory_space<vmem>>, %arg10: memref<4x12xbf16, #tpu.memory_space<vmem>>, %arg11: memref<4x1xf32, #tpu.memory_space<vmem>>, %arg12: memref<1x256xbf16, #tpu.memory_space<vmem>>, %arg13: memref<1x256xbf16, #tpu.memory_space<vmem>>, %arg14: memref<1x4x256xf32, #tpu.memory_space<vmem>>, %arg15: memref<12x401xbf16, #tpu.memory_space<vmem>>, %arg16: memref<4x401xbf16, #tpu.memory_space<vmem>>) attributes {dimension_semantics = [#tpu.dimension_semantics<parallel>], iteration_bounds = array<i64: 2>, scalar_prefetch = 0 : i64, scratch_operands = 2 : i64, tpu.core_type = #tpu.core_type<tc>, window_params = [{transform_indices = @transform_0, window_bounds = array<i64: 1, 8, 64>}, {transform_indices = @transform_1, window_bounds = array<i64: 1, 4, 256>}, {pipeline_mode = #tpu.pipeline_mode<synchronous>, transform_indices = @transform_2, window_bounds = array<i64: 64, 256>}, {pipeline_mode = #tpu.pipeline_mode<synchronous>, transform_indices = @transform_3, window_bounds = array<i64: 12, 1>}, {pipeline_mode = #tpu.pipeline_mode<synchronous>, transform_indices = @transform_4, window_bounds = array<i64: 12, 1>}, {pipeline_mode = #tpu.pipeline_mode<synchronous>, transform_indices = @transform_5, window_bounds = array<i64: 4, 108>}, {pipeline_mode = #tpu.pipeline_mode<synchronous>, transform_indices = @transform_6, window_bounds = array<i64: 4, 1>}, {pipeline_mode = #tpu.pipeline_mode<synchronous>, transform_indices = @transform_7, window_bounds = array<i64: 4, 1>}, {pipeline_mode = #tpu.pipeline_mode<synchronous>, transform_indices = @transform_8, window_bounds = array<i64: 4, 36>}, {pipeline_mode = #tpu.pipeline_mode<synchronous>, transform_indices = @transform_9, window_bounds = array<i64: 4, 12>}, {pipeline_mode = #tpu.pipeline_mode<synchronous>, transform_indices = @transform_10, window_bounds = array<i64: 4, 1>}, {pipeline_mode = #tpu.pipeline_mode<synchronous>, transform_indices = @transform_11, window_bounds = array<i64: 1, 256>}, {pipeline_mode = #tpu.pipeline_mode<synchronous>, transform_indices = @transform_12, window_bounds = array<i64: 1, 256>}, {transform_indices = @transform_13, window_bounds = array<i64: 1, 4, 256>}]} {
    %c0 = arith.constant 0 : index
    %c0_0 = arith.constant 0 : index
    %0 = vector.load %arg12[%c0, %c0_0] : memref<1x256xbf16, #tpu.memory_space<vmem>>, vector<1x256xbf16>
    %c0_1 = arith.constant 0 : index
    %c0_2 = arith.constant 0 : index
    %1 = vector.load %arg13[%c0_1, %c0_2] : memref<1x256xbf16, #tpu.memory_space<vmem>>, vector<1x256xbf16>
    %c0_3 = arith.constant 0 : index
    %c0_4 = arith.constant 0 : index
    %c0_5 = arith.constant 0 : index
    %2 = vector.load %arg1[%c0_3, %c0_4, %c0_5] : memref<1x8x64xf32, #tpu.memory_space<vmem>>, vector<1x8x64xf32>
    %3 = vector.shape_cast %2 : vector<1x8x64xf32> to vector<8x64xf32>
    %4 = arith.truncf %3 : vector<8x64xf32> to vector<8x64xbf16>
    %c0_6 = arith.constant 0 : index
    %c0_7 = arith.constant 0 : index
    %5 = vector.load %arg3[%c0_6, %c0_7] : memref<64x256xbf16, #tpu.memory_space<vmem>>, vector<64x256xbf16>
    %cst = arith.constant dense<0.000000e+00> : vector<8x256xf32>
    %6 = tpu.matmul %4, %5, %cst {dimension_numbers = #tpu.dot_dimension_numbers<[1], [0], [0], [1], [0, 0, 1, 1], [], []>} : vector<8x64xbf16>, vector<64x256xbf16>, vector<8x256xf32> -> vector<8x256xf32>
    %c0_8 = arith.constant 0 : index
    %c0_9 = arith.constant 0 : index
    %c0_10 = arith.constant 0 : index
    %7 = vector.load %arg2[%c0_8, %c0_9, %c0_10] : memref<1x4x256xf32, #tpu.memory_space<vmem>>, vector<1x4x256xf32>
    %8 = vector.shape_cast %7 : vector<1x4x256xf32> to vector<4x256xf32>
    %9 = tpu.concatenate %6, %8 in 0 : vector<8x256xf32>, vector<4x256xf32> -> vector<12x256xf32>
    %c0_11 = arith.constant 0 : index
    %c0_12 = arith.constant 0 : index
    %10 = vector.load %arg4[%c0_11, %c0_12] : memref<12x1xf32, #tpu.memory_space<vmem>>, vector<12x1xf32>
    %11 = vector.broadcast %10 : vector<12x1xf32> to vector<12x256xf32>
    %12 = arith.mulf %9, %11 : vector<12x256xf32>
    %c0_13 = arith.constant 0 : index
    %c0_14 = arith.constant 0 : index
    %13 = vector.load %arg5[%c0_13, %c0_14] : memref<12x1xf32, #tpu.memory_space<vmem>>, vector<12x1xf32>
    %14 = vector.broadcast %13 : vector<12x1xf32> to vector<12x256xf32>
    %15 = arith.addf %12, %14 : vector<12x256xf32>
    %cst_15 = arith.constant 0.000000e+00 : f32
    %16 = vector.broadcast %cst_15 : f32 to vector<12x256xf32>
    %17 = arith.maximumf %15, %16 : vector<12x256xf32>
    %cst_16 = arith.constant 0.000000e+00 : bf16
    %18 = vector.broadcast %cst_16 : bf16 to vector<12x128xbf16>
    %c0_17 = arith.constant 0 : index
    %c0_18 = arith.constant 0 : index
    %19 = vector.load %arg15[%c0_17, %c0_18] : memref<12x401xbf16, #tpu.memory_space<vmem>>, vector<12x128xbf16>
    tpu.vector_store %arg15[%c0_17, %c0_18], %18 {strides = array<i32>} : memref<12x401xbf16, #tpu.memory_space<vmem>>, vector<12x128xbf16>,
    %cst_19 = arith.constant 0.000000e+00 : bf16
    %20 = vector.broadcast %cst_19 : bf16 to vector<12x17xbf16>
    %c0_20 = arith.constant 0 : index
    %c384 = arith.constant 384 : index
    %21 = vector.load %arg15[%c0_20, %c384] : memref<12x401xbf16, #tpu.memory_space<vmem>>, vector<12x17xbf16>
    tpu.vector_store %arg15[%c0_20, %c384], %20 {strides = array<i32>} : memref<12x401xbf16, #tpu.memory_space<vmem>>, vector<12x17xbf16>,
    %22 = arith.truncf %17 : vector<12x256xf32> to vector<12x256xbf16>
    %c0_21 = arith.constant 0 : index
    %c128 = arith.constant 128 : index
    %23 = vector.load %arg15[%c0_21, %c128] : memref<12x401xbf16, #tpu.memory_space<vmem>>, vector<12x256xbf16>
    tpu.vector_store %arg15[%c0_21, %c128], %22 {strides = array<i32>} : memref<12x401xbf16, #tpu.memory_space<vmem>>, vector<12x256xbf16>,
    %c0_22 = arith.constant 0 : index
    %c111 = arith.constant 111 : index
    %24 = vector.load %arg15[%c0_22, %c111] : memref<12x401xbf16, #tpu.memory_space<vmem>>, vector<12x256xbf16>
    %25 = vector.broadcast %0 : vector<1x256xbf16> to vector<12x256xbf16>
    %26 = arith.mulf %24, %25 : vector<12x256xbf16>
    %c0_23 = arith.constant 0 : index
    %c112 = arith.constant 112 : index
    %27 = vector.load %arg15[%c0_23, %c112] : memref<12x401xbf16, #tpu.memory_space<vmem>>, vector<12x256xbf16>
    %c0_24 = arith.constant 0 : index
    %c113 = arith.constant 113 : index
    %28 = vector.load %arg15[%c0_24, %c113] : memref<12x401xbf16, #tpu.memory_space<vmem>>, vector<12x256xbf16>
    %29 = vector.broadcast %1 : vector<1x256xbf16> to vector<12x256xbf16>
    %30 = arith.mulf %28, %29 : vector<12x256xbf16>
    %c0_25 = arith.constant 0 : index
    %c127 = arith.constant 127 : index
    %31 = vector.load %arg15[%c0_25, %c127] : memref<12x401xbf16, #tpu.memory_space<vmem>>, vector<12x256xbf16>
    %32 = vector.broadcast %0 : vector<1x256xbf16> to vector<12x256xbf16>
    %33 = arith.mulf %31, %32 : vector<12x256xbf16>
    %c0_26 = arith.constant 0 : index
    %c128_27 = arith.constant 128 : index
    %34 = vector.load %arg15[%c0_26, %c128_27] : memref<12x401xbf16, #tpu.memory_space<vmem>>, vector<12x256xbf16>
    %c0_28 = arith.constant 0 : index
    %c129 = arith.constant 129 : index
    %35 = vector.load %arg15[%c0_28, %c129] : memref<12x401xbf16, #tpu.memory_space<vmem>>, vector<12x256xbf16>
    %36 = vector.broadcast %1 : vector<1x256xbf16> to vector<12x256xbf16>
    %37 = arith.mulf %35, %36 : vector<12x256xbf16>
    %c0_29 = arith.constant 0 : index
    %c143 = arith.constant 143 : index
    %38 = vector.load %arg15[%c0_29, %c143] : memref<12x401xbf16, #tpu.memory_space<vmem>>, vector<12x256xbf16>
    %39 = vector.broadcast %0 : vector<1x256xbf16> to vector<12x256xbf16>
    %40 = arith.mulf %38, %39 : vector<12x256xbf16>
    %c0_30 = arith.constant 0 : index
    %c144 = arith.constant 144 : index
    %41 = vector.load %arg15[%c0_30, %c144] : memref<12x401xbf16, #tpu.memory_space<vmem>>, vector<12x256xbf16>
    %c0_31 = arith.constant 0 : index
    %c145 = arith.constant 145 : index
    %42 = vector.load %arg15[%c0_31, %c145] : memref<12x401xbf16, #tpu.memory_space<vmem>>, vector<12x256xbf16>
    %43 = vector.broadcast %1 : vector<1x256xbf16> to vector<12x256xbf16>
    %44 = arith.mulf %42, %43 : vector<12x256xbf16>
    %45 = tpu.concatenate %26, %27, %30, %33, %34, %37, %40, %41, %44 in 0 : vector<12x256xbf16>, vector<12x256xbf16>, vector<12x256xbf16>, vector<12x256xbf16>, vector<12x256xbf16>, vector<12x256xbf16>, vector<12x256xbf16>, vector<12x256xbf16>, vector<12x256xbf16> -> vector<108x256xbf16>
    %c0_32 = arith.constant 0 : index
    %c0_33 = arith.constant 0 : index
    %46 = vector.load %arg6[%c0_32, %c0_33] : memref<4x108xbf16, #tpu.memory_space<vmem>>, vector<4x108xbf16>
    %cst_34 = arith.constant dense<0.000000e+00> : vector<4x256xf32>
    %47 = tpu.matmul %46, %45, %cst_34 {dimension_numbers = #tpu.dot_dimension_numbers<[1], [0], [0], [1], [0, 0, 1, 1], [], []>} : vector<4x108xbf16>, vector<108x256xbf16>, vector<4x256xf32> -> vector<4x256xf32>
    %c0_35 = arith.constant 0 : index
    %c0_36 = arith.constant 0 : index
    %48 = vector.load %arg7[%c0_35, %c0_36] : memref<4x1xf32, #tpu.memory_space<vmem>>, vector<4x1xf32>
    %49 = vector.broadcast %48 : vector<4x1xf32> to vector<4x256xf32>
    %50 = arith.mulf %47, %49 : vector<4x256xf32>
    %c0_37 = arith.constant 0 : index
    %c0_38 = arith.constant 0 : index
    %51 = vector.load %arg8[%c0_37, %c0_38] : memref<4x1xf32, #tpu.memory_space<vmem>>, vector<4x1xf32>
    %52 = vector.broadcast %51 : vector<4x1xf32> to vector<4x256xf32>
    %53 = arith.addf %50, %52 : vector<4x256xf32>
    %cst_39 = arith.constant 0.000000e+00 : f32
    %54 = vector.broadcast %cst_39 : f32 to vector<4x256xf32>
    %55 = arith.maximumf %53, %54 : vector<4x256xf32>
    %cst_40 = arith.constant 0.000000e+00 : bf16
    %56 = vector.broadcast %cst_40 : bf16 to vector<4x128xbf16>
    %c0_41 = arith.constant 0 : index
    %c0_42 = arith.constant 0 : index
    %57 = vector.load %arg16[%c0_41, %c0_42] : memref<4x401xbf16, #tpu.memory_space<vmem>>, vector<4x128xbf16>
    tpu.vector_store %arg16[%c0_41, %c0_42], %56 {strides = array<i32>} : memref<4x401xbf16, #tpu.memory_space<vmem>>, vector<4x128xbf16>,
    %cst_43 = arith.constant 0.000000e+00 : bf16
    %58 = vector.broadcast %cst_43 : bf16 to vector<4x17xbf16>
    %c0_44 = arith.constant 0 : index
    %c384_45 = arith.constant 384 : index
    %59 = vector.load %arg16[%c0_44, %c384_45] : memref<4x401xbf16, #tpu.memory_space<vmem>>, vector<4x17xbf16>
    tpu.vector_store %arg16[%c0_44, %c384_45], %58 {strides = array<i32>} : memref<4x401xbf16, #tpu.memory_space<vmem>>, vector<4x17xbf16>,
    %60 = arith.truncf %55 : vector<4x256xf32> to vector<4x256xbf16>
    %c0_46 = arith.constant 0 : index
    %c128_47 = arith.constant 128 : index
    %61 = vector.load %arg16[%c0_46, %c128_47] : memref<4x401xbf16, #tpu.memory_space<vmem>>, vector<4x256xbf16>
    tpu.vector_store %arg16[%c0_46, %c128_47], %60 {strides = array<i32>} : memref<4x401xbf16, #tpu.memory_space<vmem>>, vector<4x256xbf16>,
    %c0_48 = arith.constant 0 : index
    %c111_49 = arith.constant 111 : index
    %62 = vector.load %arg16[%c0_48, %c111_49] : memref<4x401xbf16, #tpu.memory_space<vmem>>, vector<4x256xbf16>
    %63 = vector.broadcast %0 : vector<1x256xbf16> to vector<4x256xbf16>
    %64 = arith.mulf %62, %63 : vector<4x256xbf16>
    %c0_50 = arith.constant 0 : index
    %c112_51 = arith.constant 112 : index
    %65 = vector.load %arg16[%c0_50, %c112_51] : memref<4x401xbf16, #tpu.memory_space<vmem>>, vector<4x256xbf16>
    %c0_52 = arith.constant 0 : index
    %c113_53 = arith.constant 113 : index
    %66 = vector.load %arg16[%c0_52, %c113_53] : memref<4x401xbf16, #tpu.memory_space<vmem>>, vector<4x256xbf16>
    %67 = vector.broadcast %1 : vector<1x256xbf16> to vector<4x256xbf16>
    %68 = arith.mulf %66, %67 : vector<4x256xbf16>
    %c0_54 = arith.constant 0 : index
    %c127_55 = arith.constant 127 : index
    %69 = vector.load %arg16[%c0_54, %c127_55] : memref<4x401xbf16, #tpu.memory_space<vmem>>, vector<4x256xbf16>
    %70 = vector.broadcast %0 : vector<1x256xbf16> to vector<4x256xbf16>
    %71 = arith.mulf %69, %70 : vector<4x256xbf16>
    %c0_56 = arith.constant 0 : index
    %c128_57 = arith.constant 128 : index
    %72 = vector.load %arg16[%c0_56, %c128_57] : memref<4x401xbf16, #tpu.memory_space<vmem>>, vector<4x256xbf16>
    %c0_58 = arith.constant 0 : index
    %c129_59 = arith.constant 129 : index
    %73 = vector.load %arg16[%c0_58, %c129_59] : memref<4x401xbf16, #tpu.memory_space<vmem>>, vector<4x256xbf16>
    %74 = vector.broadcast %1 : vector<1x256xbf16> to vector<4x256xbf16>
    %75 = arith.mulf %73, %74 : vector<4x256xbf16>
    %c0_60 = arith.constant 0 : index
    %c143_61 = arith.constant 143 : index
    %76 = vector.load %arg16[%c0_60, %c143_61] : memref<4x401xbf16, #tpu.memory_space<vmem>>, vector<4x256xbf16>
    %77 = vector.broadcast %0 : vector<1x256xbf16> to vector<4x256xbf16>
    %78 = arith.mulf %76, %77 : vector<4x256xbf16>
    %c0_62 = arith.constant 0 : index
    %c144_63 = arith.constant 144 : index
    %79 = vector.load %arg16[%c0_62, %c144_63] : memref<4x401xbf16, #tpu.memory_space<vmem>>, vector<4x256xbf16>
    %c0_64 = arith.constant 0 : index
    %c145_65 = arith.constant 145 : index
    %80 = vector.load %arg16[%c0_64, %c145_65] : memref<4x401xbf16, #tpu.memory_space<vmem>>, vector<4x256xbf16>
    %81 = vector.broadcast %1 : vector<1x256xbf16> to vector<4x256xbf16>
    %82 = arith.mulf %80, %81 : vector<4x256xbf16>
    %83 = tpu.concatenate %64, %65, %68, %71, %72, %75, %78, %79, %82 in 0 : vector<4x256xbf16>, vector<4x256xbf16>, vector<4x256xbf16>, vector<4x256xbf16>, vector<4x256xbf16>, vector<4x256xbf16>, vector<4x256xbf16>, vector<4x256xbf16>, vector<4x256xbf16> -> vector<36x256xbf16>
    %c0_66 = arith.constant 0 : index
    %c0_67 = arith.constant 0 : index
    %84 = vector.load %arg9[%c0_66, %c0_67] : memref<4x36xbf16, #tpu.memory_space<vmem>>, vector<4x36xbf16>
    %cst_68 = arith.constant dense<0.000000e+00> : vector<4x256xf32>
    %85 = tpu.matmul %84, %83, %cst_68 {dimension_numbers = #tpu.dot_dimension_numbers<[1], [0], [0], [1], [0, 0, 1, 1], [], []>} : vector<4x36xbf16>, vector<36x256xbf16>, vector<4x256xf32> -> vector<4x256xf32>
    %c0_69 = arith.constant 0 : index
    %c0_70 = arith.constant 0 : index
    %86 = vector.load %arg10[%c0_69, %c0_70] : memref<4x12xbf16, #tpu.memory_space<vmem>>, vector<4x12xbf16>
    %87 = arith.truncf %9 : vector<12x256xf32> to vector<12x256xbf16>
    %cst_71 = arith.constant dense<0.000000e+00> : vector<4x256xf32>
    %88 = tpu.matmul %86, %87, %cst_71 {dimension_numbers = #tpu.dot_dimension_numbers<[1], [0], [0], [1], [0, 0, 1, 1], [], []>} : vector<4x12xbf16>, vector<12x256xbf16>, vector<4x256xf32> -> vector<4x256xf32>
    %89 = arith.addf %85, %88 : vector<4x256xf32>
    %c0_72 = arith.constant 0 : index
    %c0_73 = arith.constant 0 : index
    %90 = vector.load %arg11[%c0_72, %c0_73] : memref<4x1xf32, #tpu.memory_space<vmem>>, vector<4x1xf32>
    %91 = vector.broadcast %90 : vector<4x1xf32> to vector<4x256xf32>
    %92 = arith.addf %89, %91 : vector<4x256xf32>
    %c0_74 = arith.constant 0 : index
    %c0_75 = arith.constant 0 : index
    %c0_76 = arith.constant 0 : index
    %93 = vector.load %arg14[%c0_74, %c0_75, %c0_76] : memref<1x4x256xf32, #tpu.memory_space<vmem>>, vector<1x4x256xf32>
    %94 = vector.shape_cast %93 : vector<1x4x256xf32> to vector<4x256xf32>
    %95 = vector.shape_cast %92 : vector<4x256xf32> to vector<1x4x256xf32>
    tpu.vector_store %arg14[%c0_74, %c0_75, %c0_76], %95 {strides = array<i32>} : memref<1x4x256xf32, #tpu.memory_space<vmem>>, vector<1x4x256xf32>,
    return
  }
  func.func @transform_0(%arg0: i32) -> (i32, i32, i32) {
    %c0_i32 = arith.constant 0 : i32
    %c0_i32_0 = arith.constant 0 : i32
    %c0_i32_1 = arith.constant 0 : i32
    return %arg0, %c0_i32, %c0_i32_0 : i32, i32, i32
  }
  func.func @transform_1(%arg0: i32) -> (i32, i32, i32) {
    %c0_i32 = arith.constant 0 : i32
    %c0_i32_0 = arith.constant 0 : i32
    %c0_i32_1 = arith.constant 0 : i32
    return %arg0, %c0_i32, %c0_i32_0 : i32, i32, i32
  }
  func.func @transform_2(%arg0: i32) -> (i32, i32) {
    %c0_i32 = arith.constant 0 : i32
    %c0_i32_0 = arith.constant 0 : i32
    %c0_i32_1 = arith.constant 0 : i32
    return %c0_i32, %c0_i32_0 : i32, i32
  }
  func.func @transform_3(%arg0: i32) -> (i32, i32) {
    %c0_i32 = arith.constant 0 : i32
    %c0_i32_0 = arith.constant 0 : i32
    %c0_i32_1 = arith.constant 0 : i32
    return %c0_i32, %c0_i32_0 : i32, i32
  }
  func.func @transform_4(%arg0: i32) -> (i32, i32) {
    %c0_i32 = arith.constant 0 : i32
    %c0_i32_0 = arith.constant 0 : i32
    %c0_i32_1 = arith.constant 0 : i32
    return %c0_i32, %c0_i32_0 : i32, i32
  }
  func.func @transform_5(%arg0: i32) -> (i32, i32) {
    %c0_i32 = arith.constant 0 : i32
    %c0_i32_0 = arith.constant 0 : i32
    %c0_i32_1 = arith.constant 0 : i32
    return %c0_i32, %c0_i32_0 : i32, i32
  }
  func.func @transform_6(%arg0: i32) -> (i32, i32) {
    %c0_i32 = arith.constant 0 : i32
    %c0_i32_0 = arith.constant 0 : i32
    %c0_i32_1 = arith.constant 0 : i32
    return %c0_i32, %c0_i32_0 : i32, i32
  }
  func.func @transform_7(%arg0: i32) -> (i32, i32) {
    %c0_i32 = arith.constant 0 : i32
    %c0_i32_0 = arith.constant 0 : i32
    %c0_i32_1 = arith.constant 0 : i32
    return %c0_i32, %c0_i32_0 : i32, i32
  }
  func.func @transform_8(%arg0: i32) -> (i32, i32) {
    %c0_i32 = arith.constant 0 : i32
    %c0_i32_0 = arith.constant 0 : i32
    %c0_i32_1 = arith.constant 0 : i32
    return %c0_i32, %c0_i32_0 : i32, i32
  }
  func.func @transform_9(%arg0: i32) -> (i32, i32) {
    %c0_i32 = arith.constant 0 : i32
    %c0_i32_0 = arith.constant 0 : i32
    %c0_i32_1 = arith.constant 0 : i32
    return %c0_i32, %c0_i32_0 : i32, i32
  }
  func.func @transform_10(%arg0: i32) -> (i32, i32) {
    %c0_i32 = arith.constant 0 : i32
    %c0_i32_0 = arith.constant 0 : i32
    %c0_i32_1 = arith.constant 0 : i32
    return %c0_i32, %c0_i32_0 : i32, i32
  }
  func.func @transform_11(%arg0: i32) -> (i32, i32) {
    %c0_i32 = arith.constant 0 : i32
    %c0_i32_0 = arith.constant 0 : i32
    %c0_i32_1 = arith.constant 0 : i32
    return %c0_i32, %c0_i32_0 : i32, i32
  }
  func.func @transform_12(%arg0: i32) -> (i32, i32) {
    %c0_i32 = arith.constant 0 : i32
    %c0_i32_0 = arith.constant 0 : i32
    %c0_i32_1 = arith.constant 0 : i32
    return %c0_i32, %c0_i32_0 : i32, i32
  }
  func.func @transform_13(%arg0: i32) -> (i32, i32, i32) {
    %c0_i32 = arith.constant 0 : i32
    %c0_i32_0 = arith.constant 0 : i32
    %c0_i32_1 = arith.constant 0 : i32
    return %arg0, %c0_i32, %c0_i32_0 : i32, i32, i32
  }
}

</mosaic_0001>

<bundles_post_ra>
// kernel: tpu_custom_call.1
= control target key start
LH: loop header
LB: loop body
LE: loop exit
PB: predicated region body
PF: predicated region fallthrough
CT: control target
= control target key end

     0   :  { %s2685_s0 = inlined_call_operand.vmem [shape: f32[2,8,64], index: 0, kind: input, shape index: {}]   ;;  %s2686_s1 = inlined_call_operand.vmem [shape: f32[2,4,256], index: 1, kind: input, shape index: {}]   ;;  %s2687_s2 = inlined_call_operand.hbm [shape: bf16[64,256], index: 2, kind: input, shape index: {}]   ;;  %s2688_s3 = inlined_call_operand.vmem [shape: f32[12,1], index: 3, kind: input, shape index: {}]   ;;  %s2689_s4 = inlined_call_operand.vmem [shape: f32[12,1], index: 4, kind: input, shape index: {}]   ;;  %s2690_s5 = inlined_call_operand.vmem [shape: bf16[4,108], index: 5, kind: input, shape index: {}]   ;;  %s2691_s6 = inlined_call_operand.vmem [shape: f32[4,1], index: 6, kind: input, shape index: {}]   ;;  %s2692_s7 = inlined_call_operand.vmem [shape: f32[4,1], index: 7, kind: input, shape index: {}]   ;;  %s2693_s8 = inlined_call_operand.vmem [shape: bf16[4,36], index: 8, kind: input, shape index: {}]   ;;  %s2694_s9 = inlined_call_operand.vmem [shape: bf16[4,12], index: 9, kind: input, shape index: {}]   ;;  %s2695_s10 = inlined_call_operand.vmem [shape: f32[4,1], index: 10, kind: input, shape index: {}]   ;;  %s2696_s11 = inlined_call_operand.vmem [shape: bf16[1,256], index: 11, kind: input, shape index: {}]   ;;  %s2697_s12 = inlined_call_operand.vmem [shape: bf16[1,256], index: 12, kind: input, shape index: {}]   ;;  %s2698_s13 = inlined_call_operand.hbm [shape: f32[2,4,256], index: 13, kind: output, shape index: {}]  }
   0x1   :  { %2710 = sst [smem:[#allocation10_spill]] %s2685_s0 }
   0x2   :  { %2711 = sst [smem:[#allocation11_spill]] %s2686_s1 }
   0x3   :  { %2712 = sst [smem:[#allocation12_spill]] %s2687_s2 }
   0x4   :  { %18 = vsyncpa [#allocation5], 0 }
   0x5   :  { %19 = vsyncpa [#allocation6], 0 }
   0x6   :  { %21 = vsyncpa [#allocation6 + $0x1], 0  ;;  %s2157_s25 = smov 0   ;;  %s2159_s26 = smov 0  }
   0x7   :  { %s2161_s27 = smov 0   ;;  %s2163_s28 = smov 0  }
   0x8 LB: > { %s2178_s29 = sadd.s32 4294967295, %s2069_s28   ;;  %s1781_s30 = sadd.s32 4294967294, %s2069_s28   ;;  %s2069_s28 = sphi %s2163_s28, %s2728_s28   ;;  %s2065_s27 = sphi %s2161_s27, %s2727_s27   ;;  %s2061_s26 = sphi %s2159_s26, %s2726_s26   ;;  %s2057_s25 = sphi %s2157_s25, %s2725_s25  }
   0x9   : > { %s2182_s14 = sadd.s32 1, %s2069_s28   ;;  %s317_s15 = sadd.s32 1, %s2065_s27 }
   0xa   : > { %s314_s16 = ssub.s32 %s2069_s28, %s2182_s14  ;;  %p327_p0 = scmp.ne.s32.totalorder %s2065_s27, %s2061_s26 }
   0xb   : > { %p315_p1 = scmp.eq.s32.totalorder %s314_s16, 0  ;;  %p328_p2 = scmp.eq.s32.totalorder %s2178_s29, 1 }
   0xc   : > { %p333_p3 = scmp.ne.s32.totalorder %s2061_s26, %s2057_s25  ;;  %p334_p4 = scmp.eq.s32.totalorder %s1781_s30, 1 }
   0xd   : > { %s2193_s17 = scalar_select %p315_p1, %s2065_s27, %s317_s15  }
   0xe   : > { %p2195_p5 = por %p328_p2, %p327_p0  ;;  %p2199_p6 = por %p334_p4, %p333_p3 }
   0xf   : > { %p1782_p7 = scmp.ge.s32.totalorder %s2069_s28, 1  ;;  %p341_p8 = scmp.lt.s32.totalorder %s2069_s28, 3 }
  0x10   : > { %p1890_p9 = scmp.eq.s32.totalorder %s2178_s29, 0  ;;  %s2715_s2 = sld [smem:[#allocation12_spill]] }
  0x11   : > { %p342_p10 = pnand %p1782_p7, %p341_p8  ;;  %s2071_s23 = smov [#allocation4]  }
  0x12   : > { %s354_s24 = sshll.u32 %s2071_s23, 4  ;;  %s2072_s30 = smov 128   ;;  %s355_s24 = int_to_ptr.vmem [resolvable:$true] %s354_s24 }
  0x13   : > { %p1882_p11 = pneg %p342_p10  ;;  %s2073_s15 = smov 8  }
  0x14   : > { %415 = sbr.rel (%p342_p10) target bundleno = 1264 (0x4f0), region = 72 }
  0x15   : > { %p1883_p12 = pnand %p1890_p9, %p1882_p11 }
  0x16   : > { %s352_s22 = sshll.u32 %s2715_s2, 4  ;;  %s353_s22 = int_to_ptr.hbm [resolvable:$true] %s352_s22 }
  0x17   : > { %1885 = dma.hbm_to_vmem [thread:$0]  (!%p1883_p12), %s353_s22, 1024, %s355_s24, [#allocation5], %s2072_s30, %s2072_s30, %s2073_s15  }
  0x19   : > { %2048 = dma.done.wait (%p1890_p9), [#allocation5], 1024  }
  0x1a   : > { %2050 = vsyncadd (%p1890_p9), [#allocation5], 4294966272  ;;  %vm601_vm0 = vcmask 134144   ;;  %vm603_vm1 = vcmask 132096   ;;  %v2074_v0 = vmov 0   ;;  %p464_p13 = scmp.lt.s32.totalorder %s2178_s29, 1 }
  0x1b   : > { %1942 = vset.pattern.permute.xlu1 %v2074_v0  ;;  %599 = vst [vmem:[#allocation2] sm:$0xf] %v2074_v0  ;;  %1941 = vset.pattern.permute.xlu0 %v2074_v0  ;;  %v579_v1 = vld [vmem:[%s2689_s4] sm:$0xff]  ;;  %v1868_v4 = vld [vmem:[#allocation4 + $0x34] sm:$0xf0]  ;;  %s2716_s1 = sld [smem:[#allocation11_spill]] }
  0x1c   : > { %600 = vst [vmem:[#allocation2 + $0x10] sm:$0x3] %v2074_v0  ;;  %s2217_s16 = scalar_select %p464_p13, %s2178_s29, 1  ;;  %v563_v2 = vld [vmem:[%s2688_s3] sm:$0xff]  ;;  %583 = vperm.xlu1 %1942, %v579_v1   ;;  %v1819_v6 = vld [vmem:[#allocation4 + $0x38] sm:$0xf0] }
  0x1d   : > { %602 = vst.msk [vmem:[#allocation2 + $0xc] sm:$0xf] %vm601_vm0, %v2074_v0  ;;  %v1817_v3 = vld [vmem:[#allocation4 + $0x30] sm:$0xf]  ;;  %567 = vperm.xlu0 %1941, %v563_v2   ;;  %v1867_v5 = vld [vmem:[#allocation4 + $0x34] sm:$0xf] }
  0x1e   : > { %604 = vst.msk [vmem:[#allocation2 + $0x1c] sm:$0x3] %vm603_vm1, %v2074_v0  ;;  %s1788_s24 = sshll.u32 %s2217_s16, 3  ;;  %v1818_v7 = vor.u32 %v1868_v4, %v1817_v3  ;;  %v1822_v8 = vor.u32 %v1867_v5, %v1819_v6  ;;  %v1809_v9 = vld [vmem:[#allocation4 + $0x20] sm:$0xf]  ;;  %s2717_s0 = sld [smem:[#allocation10_spill]] }
  0x1f   : > { %1191 = vst [vmem:[#allocation3] sm:$0x3] %v2074_v0  ;;  %v1866_v10 = vld [vmem:[#allocation4 + $0x24] sm:$0xf0]  ;;  %v1865_v11 = vld [vmem:[#allocation4 + $0x24] sm:$0xf] }
  0x20   : > { %1192 = vst.msk [vmem:[#allocation3 + $0x6] sm:$0x3] %vm603_vm1, %v2074_v0  ;;  %v1811_v12 = vld [vmem:[#allocation4 + $0x28] sm:$0xf0]  ;;  %534 = vmatpush.bf16.msra.mxu0 %v1818_v7  ;;  %547 = vmatpush.bf16.msra.mxu1 %v1822_v8  ;;  %v1810_v13 = vor.u32 %v1866_v10, %v1809_v9  ;;  %v1801_v15 = vld [vmem:[#allocation4 + $0x10] sm:$0xf] }
  0x21   : > { %v1814_v14 = vor.u32 %v1865_v11, %v1811_v12  ;;  %v1864_v16 = vld [vmem:[#allocation4 + $0x14] sm:$0xf0]  ;;  %v1863_v17 = vld [vmem:[#allocation4 + $0x14] sm:$0xf]  ;;  %v1803_v18 = vld [vmem:[#allocation4 + $0x18] sm:$0xf0]  ;;  %s472_s20 = scalar_lea.vmem %s2716_s1, %s1788_s24 }
  0x22   : > { %v580_v19 = vld [vmem:[%s2689_s4 + $0x8] sm:$0xf]  ;;  %v1793_v22 = vld [vmem:[#allocation4] sm:$0xf]  ;;  %v1862_v23 = vld [vmem:[#allocation4 + $0x4] sm:$0xf0]  ;;  %v1802_v25 = vor.u32 %v1864_v16, %v1801_v15  ;;  %v1806_v26 = vor.u32 %v1863_v17, %v1803_v18 }
  0x23   : > { %v564_v20 = vld [vmem:[%s2688_s3 + $0x8] sm:$0xf]  ;;  %v1861_v27 = vld [vmem:[#allocation4 + $0x4] sm:$0xf]  ;;  %v556_v29 = vld [vmem:[%s472_s20] sm:$0xff]  ;;  %v1794_v35 = vor.u32 %v1862_v23, %v1793_v22  ;;  %s2704_s21 = smov 95  }
  0x24   : > { %v1847_v21 = vld [vmem:[#allocation2 + $0xc] sm:$0xf]  ;;  %535 = vmatpush.bf16.msra.mxu0 %v1810_v13  ;;  %548 = vmatpush.bf16.msra.mxu1 %v1814_v14  ;;  %v1827_v30 = vld [vmem:[#allocation2] sm:$0xf]  ;;  %v1795_v31 = vld [vmem:[#allocation4 + $0x8] sm:$0xf0]  ;;  %s467_s15 = scalar_lea.vmem %s2717_s0, %s1788_s24 }
  0x25   : > { %v1874_v24 = vld [vmem:[#allocation2 + $0x18] sm:$0x30]  ;;  %588 = vperm.xlu1 %1942, %v580_v19   ;;  %572 = vperm.xlu0 %1941, %v564_v20   ;;  %558 = vst [vmem:[#allocation1] ss:$2 sm:$0xff] %v556_v29  ;;  %v1870_v32 = vld [vmem:[#allocation2 + $0xc] sm:$0x30]  ;;  %v1798_v36 = vor.u32 %v1861_v27, %v1795_v31 }
  0x26   : > { %v1848_v28 = vor.u32 %v1874_v24, %v1847_v21  ;;  %v1828_v34 = vor.u32 %v1870_v32, %v1827_v30  ;;  %v476_v37 = vld [vmem:[%s467_s15] sm:$0xff]  ;;  %vm526_vm2 = vcmask 523264   ;;  %s2076_s16 = smov 127   ;;  %s2699_s30 = smov 15   ;;  %v726_v2 = vld [vmem:[#allocation2 + $0xc] sm:$0xf] }
  0x27   : > { %v474_v39 = vld [vmem:[%s2696_s11] sm:$0x3]  ;;  %v477_v40 = vpack.c.bf16 %v476_v37, %v476_v37  ;;  %s2701_s2 = smov 1   ;;  %s2079_s15 = smov 111   ;;  %v727_v1 = vld [vmem:[#allocation2 + $0x1c] sm:$0x3]  ;;  %v2267_v4 = vunpack.c.l.bf16 %v726_v2 }
  0x28   : > { %v966_v33 = vrot.slane %v1848_v28, 6  ;;  %536 = vmatpush.bf16.msra.mxu0 %v1802_v25  ;;  %549 = vmatpush.bf16.msra.mxu1 %v1806_v26  ;;  %v817_v38 = vrot.slane %v1828_v34, 2  ;;  %v2254_v43 = vld [vmem:[%s2697_s12] sm:$0x3]  ;;  %s2080_s20 = smov 17   ;;  %s2700_s22 = smov 113   ;;  %v2265_v3 = vunpack.c.l.bf16 %v727_v1 }
  0x29   : > { %s2708_s24 = smov 96   ;;  %vm757_vm3 = vcmask 121856   ;;  %vm680_vm4 = vcmask 924672   ;;  %vm998_vm5 = vcmask 1045504   ;;  %s2706_s23 = smov 94   ;;  %vm637_vm6 = vcmask 908288  }
  0x2a   : > { %971 = vrot.lane.b32.xlu2 %v966_v33, %s2704_s21  ;;  %vm776_vm7 = vcmask 138240   ;;  %vm738_vm8 = vcmask 7168   ;;  %vm709_vm9 = vcmask 1039360   ;;  %vm857_vm10 = vcmask 1031168  }
  0x2b   : > { %vm954_vm11 = vcmask 785408   ;;  %vm973_vm12 = vcmask 777216   ;;  %vm1015_vm13 = vcmask 1041408   ;;  %vm995_vm14 = vcmask 769024  }
  0x2c   : > { %537 = vmatpush.bf16.msra.mxu0 %v1794_v35  ;;  %550 = vmatpush.bf16.msra.mxu1 %v1798_v36  ;;  %v2246_v41 = vld.sshfl [vmem:[#allocation1] sm:$0xff pattern:$0x75316420]  ;;  %v2248_v42 = vld.sshfl [vmem:[#allocation1 + $0x8] sm:$0xff pattern:$0x75316420] }
  0x2d   : > { %614 = vst [vmem:[#allocation1] ss:$9 sm:$0xff] %v474_v39  ;;  %820 = vrot.lane.b32.xlu0 %v817_v38, %s2076_s16  ;;  %vm1008_vm15 = vcmask 1043456   ;;  %vm923_vm0 = vcmask 900096   ;;  %vm884_vm1 = vcmask 916480  }
  0x2f   : > { %1823 = vmatmul.msk.bf16.vlgmr.msra.gmra.mxu0 %vm526_vm2, %v477_v40  ;;  %1824 = vmatmul.msk.bf16.vlgmr.msra.gmra.mxu1 %vm526_vm2, %v477_v40  ;;  %vm1137_vm2 = vcmask 883712  }
  0x34   : > { %v615_v44 = vld [vmem:[#allocation1] sm:$0xff]  ;;  %v616_v45 = vld [vmem:[#allocation1 + $0x9] sm:$0xff] }
  0x35   : > { %657 = vst [vmem:[#allocation1] ss:$9 sm:$0xff] %v2254_v43  ;;  %v617_v46 = vpack.i.b16 %v615_v44, %v615_v44  ;;  %v620_v47 = vpack.i.b16 %v616_v45, %v616_v45 }
  0x37   : > { %v619_v48 = vperm.slane %v617_v46, 0  ;;  %v622_v49 = vperm.slane %v620_v47, 0 }
  0x39   : > { %v629_v50 = vunpack.c.l.bf16 %v619_v48  ;;  %v630_v51 = vunpack.c.l.bf16 %v622_v49 }
  0x3b   : > { %v1948_v52 = vpack.i.bf16 %v630_v51, %v629_v50 }
  0x3c   : > { %v658_v53 = vld [vmem:[#allocation1] sm:$0xff]  ;;  %v659_v54 = vld [vmem:[#allocation1 + $0x9] sm:$0xff] }
  0x3d   : > { %1202 = vst [vmem:[#allocation1] ss:$9 sm:$0xff] %v474_v39  ;;  %1949 = vrot.lane.b32.xlu1 %v1948_v52, %s2076_s16  ;;  %1944 = vrot.lane.b32.xlu2 %v1948_v52, %s2699_s30  ;;  %v660_v55 = vpack.i.b16 %v658_v53, %v658_v53  ;;  %v663_v56 = vpack.i.b16 %v659_v54, %v659_v54  ;;  %s2084_s30 = smov 126  }
  0x3f   : > { %v662_v57 = vperm.slane %v660_v55, 0  ;;  %v665_v58 = vperm.slane %v663_v56, 0 }
  0x41   : > { %v672_v59 = vunpack.c.l.bf16 %v662_v57  ;;  %v673_v60 = vunpack.c.l.bf16 %v665_v58 }
  0x43   : > { %v1963_v61 = vpack.i.bf16 %v673_v60, %v672_v59 }
  0x45   : > { %1964 = vrot.lane.b32.xlu0 %v1963_v61, %s2701_s2  ;;  %1954 = vrot.lane.b32.xlu2 %v1948_v52, %s2079_s15  ;;  %s2702_s2 = smov 112  }
  0x4d   : > { %1959 = vrot.lane.b32.xlu2 %v1963_v61, %s2080_s20 }
  0x55   : > { %1969 = vrot.lane.b32.xlu2 %v1963_v61, %s2700_s22  ;;  %s2085_s22 = smov 110  }
  0x84   : > { %v2263_v62 = vpop.permute.xlu2 %971 }
  0x8e   : > { %v584_v0 = vpop.permute.xlu1 %583 }
  0x8f   : > { %v568_v63 = vpop.permute.xlu0 %567 }
  0x97   : > { %v1945_v5 = vpop.permute.xlu2 %1944  ;;  %v573_v7 = vpop.permute.xlu0 %572 }
  0x98   : > { %v1947_v6 = vunpack.i.h.bf16 %v1945_v5  ;;  %v577_v8 = vmul.f32 %v573_v7, %v2246_v41  ;;  %v578_v9 = vmul.f32 %v573_v7, %v2248_v42  ;;  %v589_v10 = vpop.permute.xlu1 %588  ;;  %v2290_v39 = vunpack.i.l.bf16 %v1945_v5 }
  0x9a   : > { %v767_v11 = vmul.f32 %v1947_v6, %v2265_v3  ;;  %v764_v12 = vmul.f32 %v1947_v6, %v2267_v4  ;;  %v593_v13 = vadd.f32 %v589_v10, %v577_v8  ;;  %v594_v14 = vadd.f32 %v589_v10, %v578_v9 }
  0x9b   : > { %v2304_v57 = vsel %vm757_vm3, %v2290_v39, %v1947_v6 }
  0x9c   : > { %v771_v15 = vpack.c.bf16 %v767_v11, %v767_v11  ;;  %v597_v16 = vmax.f32 %v593_v13, 0.0  ;;  %v598_v17 = vmax.f32 %v594_v14, 0.0  ;;  %v769_v19 = vpack.c.bf16 %v764_v12, %v764_v12 }
  0x9e   : > { %v935_v18 = vunpack.c.l.b16 %v771_v15  ;;  %v606_v20 = vpack.c.bf16 %v598_v17, %v597_v16  ;;  %v932_v23 = vunpack.c.l.b16 %v769_v19 }
  0x9f   : > { %v2273_v21 = vpop.permute.xlu2 %1954  ;;  %v2286_v32 = vpop.permute.xlu0 %820 }
  0xa0   : > { %v941_v22 = vpack.c.b16 %v935_v18, %v935_v18  ;;  %608 = vst [vmem:[#allocation2 + $0x14] sm:$0x33] %v606_v20  ;;  %v938_v24 = vpack.c.b16 %v932_v23, %v932_v23 }
  0xa2   : > { %952 = vrot.lane.b32.xlu2 %v941_v22, %s2708_s24 }
  0xa7   : > { %v2276_v25 = vpop.permute.xlu2 %1959  ;;  %v725_v29 = vld [vmem:[#allocation2 + $0x14] sm:$0x33] }
  0xa8   : > { %v2279_v26 = vunpack.i.h.bf16 %v2276_v25  ;;  %v655_v35 = vld [vmem:[#allocation2 + $0x18] sm:$0x3]  ;;  %v2288_v36 = vunpack.c.l.bf16 %v725_v29  ;;  %v2292_v40 = vunpack.c.h.bf16 %v725_v29  ;;  %v654_v47 = vld [vmem:[#allocation2 + $0x10] sm:$0x33] }
  0xa9   : > { %v671_v51 = vunpack.c.l.bf16 %v655_v35  ;;  %v669_v58 = vunpack.c.l.bf16 %v654_v47  ;;  %v670_v59 = vunpack.c.h.bf16 %v654_v47 }
  0xaa   : > { %v783_v27 = vmul.f32 %v2279_v26, %v2267_v4  ;;  %v786_v28 = vmul.f32 %v2279_v26, %v2265_v3  ;;  %946 = vrot.lane.b32.xlu2 %v938_v24, %s2708_s24  ;;  %v765_v56 = vmul.f32 %v2290_v39, %v2288_v36 }
  0xac   : > { %v539_v30 = vpop.f32.mrf.mxu0  ;;  %v552_v31 = vpop.f32.mrf.mxu1  ;;  %v788_v33 = vpack.c.bf16 %v783_v27, %v783_v27  ;;  %v790_v34 = vpack.c.bf16 %v786_v28, %v786_v28 }
  0xad   : > { %v575_v37 = vmul.f32 %v568_v63, %v539_v30  ;;  %v576_v38 = vmul.f32 %v568_v63, %v552_v31  ;;  %v1559_v50 = vpack.c.bf16 %v2246_v41, %v539_v30  ;;  %v1560_v55 = vpack.c.bf16 %v2248_v42, %v552_v31 }
  0xae   : > { %v982_v45 = vunpack.c.l.b16 %v788_v33  ;;  %v985_v46 = vunpack.c.l.b16 %v790_v34  ;;  %v766_v63 = vmul.f32 %v2304_v57, %v2292_v40  ;;  %v611_v33 = vld [vmem:[#allocation2 + $0x10] sm:$0x33]  ;;  %v698_v34 = vld [vmem:[#allocation2 + $0x18] sm:$0x3] }
  0xaf   : > { %v1970_v44 = vpop.permute.xlu2 %1969  ;;  %v591_v53 = vadd.f32 %v584_v0, %v575_v37  ;;  %v592_v54 = vadd.f32 %v584_v0, %v576_v38  ;;  %v1566_v2 = vsel %vm998_vm5, %v1559_v50, 0  ;;  %v1569_v5 = vsel %vm998_vm5, %v1560_v55, 0  ;;  %v2334_v35 = vpop.permute.xlu1 %1949  ;;  %v1871_v55 = vld [vmem:[#allocation2 + $0x14] sm:$0x30] }
  0xb0   : > { %v2294_v48 = vunpack.i.h.bf16 %v1970_v44  ;;  %v2296_v49 = vunpack.i.l.bf16 %v1970_v44  ;;  %v988_v52 = vpack.c.b16 %v985_v46, %v982_v45  ;;  %v770_v8 = vpack.c.bf16 %v766_v63, %v765_v56  ;;  %1578 = vmatpush.bf16.msrb.mxu0 %v1566_v2  ;;  %1591 = vmatpush.bf16.msrb.mxu1 %v1569_v5 }
  0xb1   : > { %v595_v41 = vmax.f32 %v591_v53, 0.0  ;;  %v596_v42 = vmax.f32 %v592_v54, 0.0  ;;  %v2337_v50 = vunpack.i.h.bf16 %v2273_v21  ;;  %v704_v53 = vunpack.c.l.bf16 %v698_v34 }
  0xb2   : > { %993 = vrot.lane.b32.xlu2 %v988_v52, %s2706_s23  ;;  %v2310_v60 = vsel %vm680_vm4, %v2296_v49, %v2294_v48  ;;  %v690_v61 = vmul.f32 %v2294_v48, %v671_v51  ;;  %v688_v9 = vmul.f32 %v2296_v49, %v669_v58  ;;  %v934_v14 = vunpack.c.h.b16 %v770_v8 }
  0xb3   : > { %v2317_v6 = vpack.c.bf16 %v596_v42, %v595_v41  ;;  %v689_v10 = vmul.f32 %v2310_v60, %v670_v59  ;;  %v933_v15 = vunpack.c.l.b16 %v770_v8  ;;  %v1956_v51 = vunpack.i.l.bf16 %v2273_v21  ;;  %v1873_v8 = vld [vmem:[#allocation2 + $0x10] sm:$0x30] }
  0xb4   : > { %v541_v0 = vpop.f32.mrf.mxu0  ;;  %v554_v1 = vpop.f32.mrf.mxu1  ;;  %v694_v7 = vpack.c.bf16 %v690_v61, %v690_v61  ;;  %v940_v23 = vpack.c.b16 %v934_v14, %v934_v14  ;;  %v626_v52 = vunpack.c.l.bf16 %v611_v33  ;;  %v2342_v54 = vunpack.i.h.bf16 %v2334_v35 }
  0xb5   : > { %607 = vst [vmem:[#allocation2 + $0x4] sm:$0xff] %v2317_v6  ;;  %v693_v19 = vpack.c.bf16 %v689_v10, %v688_v9  ;;  %v939_v24 = vpack.c.b16 %v933_v15, %v933_v15  ;;  %v627_v21 = vunpack.c.h.bf16 %v611_v33  ;;  %v638_v0 = vsel %vm637_vm6, %v1956_v51, %v2337_v50 }
  0xb6   : > { %v838_v13 = vunpack.c.l.b16 %v694_v7  ;;  %950 = vrot.lane.b32.xlu1 %v940_v23, %s2708_s24  ;;  %v645_v1 = vmul.f32 %v1956_v51, %v626_v52  ;;  %v1961_v2 = vunpack.i.l.bf16 %v2276_v25  ;;  %v719_v5 = vmul.f32 %v2342_v54, %v704_v53  ;;  %v1829_v53 = vld [vmem:[#allocation2 + $0x10] sm:$0x30] }
  0xb7   : > { %v2321_v11 = vpop.permute.xlu0 %1964  ;;  %948 = vrot.lane.b32.xlu0 %v939_v24, %s2708_s24  ;;  %v837_v29 = vunpack.c.h.b16 %v693_v19  ;;  %v2356_v7 = vunpack.c.l.bf16 %v2317_v6  ;;  %v729_v15 = vunpack.c.h.bf16 %v2317_v6 }
  0xb8   : > { %v2325_v12 = vunpack.i.h.bf16 %v2321_v11  ;;  %v844_v18 = vpack.c.b16 %v838_v13, %v838_v13 }
  0xb9   : > { %v843_v38 = vpack.c.b16 %v837_v29, %v837_v29  ;;  %v781_v6 = vmul.f32 %v1961_v2, %v2356_v7 }
  0xba   : > { %v745_v16 = vmul.f32 %v2325_v12, %v2267_v4  ;;  %v748_v17 = vmul.f32 %v2325_v12, %v2265_v3  ;;  %855 = vrot.lane.b32.xlu2 %v844_v18, %s2084_s30  ;;  %v836_v4 = vunpack.c.l.b16 %v693_v19  ;;  %v646_v18 = vmul.f32 %v638_v0, %v627_v21 }
  0xbb   : > { %v763_v21 = vmul.f32 %v2304_v57, %v729_v15 }
  0xbc   : > { %v750_v20 = vpack.c.bf16 %v745_v16, %v745_v16  ;;  %v752_v22 = vpack.c.bf16 %v748_v17, %v748_v17  ;;  %v653_v31 = vld [vmem:[#allocation2 + $0x8] sm:$0xf]  ;;  %v842_v44 = vpack.c.b16 %v836_v4, %v836_v4  ;;  %v652_v47 = vld [vmem:[#allocation2] sm:$0xff]  ;;  %v650_v19 = vpack.c.bf16 %v646_v18, %v645_v1 }
  0xbd   : > { %v668_v37 = vunpack.c.l.bf16 %v653_v31  ;;  %v1835_v45 = vld [vmem:[#allocation2 + $0x8] sm:$0xf]  ;;  %v2347_v41 = vunpack.c.h.bf16 %v652_v47  ;;  %v1839_v61 = vld [vmem:[#allocation2 + $0x4] sm:$0xf]  ;;  %v2349_v63 = vunpack.c.l.bf16 %v652_v47 }
  0xbe   : > { %v907_v27 = vunpack.c.l.b16 %v750_v20  ;;  %v910_v28 = vunpack.c.l.b16 %v752_v22  ;;  %v696_v46 = vld [vmem:[#allocation2 + $0x8] sm:$0xf]  ;;  %853 = vrot.lane.b32.xlu1 %v843_v38, %s2084_s30  ;;  %v1836_v56 = vor.u32 %v1871_v55, %v1835_v45  ;;  %v1840_v17 = vor.u32 %v1873_v8, %v1839_v61  ;;  %v1869_v47 = vld [vmem:[#allocation2 + $0x4] sm:$0xf] }
  0xbf   : > { %851 = vrot.lane.b32.xlu0 %v842_v44, %s2084_s30  ;;  %v687_v58 = vmul.f32 %v2294_v48, %v668_v37  ;;  %v701_v59 = vunpack.c.l.bf16 %v696_v46  ;;  %v1872_v42 = vld [vmem:[#allocation2 + $0x8] sm:$0xf]  ;;  %v1841_v48 = vld [vmem:[#allocation2 + $0x14] sm:$0x30]  ;;  %v643_v14 = vmul.f32 %v2347_v41, %v638_v0  ;;  %v642_v25 = vmul.f32 %v1956_v51, %v2349_v63 }
  0xc0   : > { %v913_v30 = vpack.c.b16 %v910_v28, %v907_v27  ;;  %v819_v9 = vrot.slane %v1836_v56, 2  ;;  %v1844_v16 = vor.u32 %v1872_v42, %v1841_v48  ;;  %v777_v20 = vsel %vm776_vm7, %v1961_v2, %v2279_v26 }
  0xc1   : > { %v692_v10 = vpack.c.bf16 %v687_v58, %v687_v58  ;;  %v716_v13 = vmul.f32 %v2342_v54, %v701_v59  ;;  %v648_v24 = vpack.c.bf16 %v643_v14, %v642_v25  ;;  %v723_v27 = vpack.c.bf16 %v719_v5, %v719_v5 }
  0xc2   : > { %v916_v3 = vrot.slane %v913_v30, 2  ;;  %v782_v28 = vmul.f32 %v777_v20, %v729_v15  ;;  %v799_v4 = vunpack.c.h.b16 %v650_v19  ;;  %v798_v31 = vunpack.c.l.b16 %v650_v19 }
  0xc3   : > { %v835_v22 = vunpack.c.l.b16 %v692_v10  ;;  %v721_v23 = vpack.c.bf16 %v716_v13, %v716_v13  ;;  %v796_v29 = vunpack.c.h.b16 %v648_v24  ;;  %v795_v30 = vunpack.c.l.b16 %v648_v24 }
  0xc4   : > { %921 = vrot.lane.b32.xlu2 %v916_v3, %s2085_s22  ;;  %v784_v3 = vmul.f32 %v1961_v2, %v2288_v36  ;;  %v785_v33 = vmul.f32 %v777_v20, %v2292_v40  ;;  %v965_v44 = vrot.slane %v1844_v16, 6  ;;  %v964_v45 = vrot.slane %v1840_v17, 6 }
  0xc5   : > { %v841_v34 = vpack.c.b16 %v835_v22, %v835_v22  ;;  %v868_v37 = vunpack.c.l.b16 %v721_v23  ;;  %v2370_v38 = vpack.c.b16 %v799_v4, %v796_v29  ;;  %v2372_v26 = vpack.c.b16 %v798_v31, %v795_v30 }
  0xc6   : > { %897 = vrot.lane.b32.xlu1 %v1844_v16, %s2079_s15  ;;  %v787_v46 = vpack.c.bf16 %v782_v28, %v781_v6  ;;  %v871_v51 = vunpack.c.l.b16 %v723_v27  ;;  %v789_v52 = vpack.c.bf16 %v785_v33, %v784_v3  ;;  %v1832_v56 = vor.u32 %v1869_v47, %v1829_v53 }
  0xc7   : > { %895 = vrot.lane.b32.xlu0 %v1840_v17, %s2079_s15  ;;  %v762_v59 = vmul.f32 %v2290_v39, %v2356_v7  ;;  %v1966_v5 = vunpack.i.l.bf16 %v2321_v11  ;;  %v685_v39 = vmul.f32 %v2296_v49, %v2349_v63  ;;  %v686_v57 = vmul.f32 %v2310_v60, %v2347_v41  ;;  %v697_v49 = vld [vmem:[#allocation2 + $0x10] sm:$0x33] }
  0xc8   : > { %v874_v55 = vpack.c.b16 %v871_v51, %v868_v37  ;;  %v980_v58 = vunpack.c.l.b16 %v787_v46  ;;  %v983_v42 = vunpack.c.l.b16 %v789_v52  ;;  %v818_v0 = vrot.slane %v1832_v56, 2 }
  0xc9   : > { %v768_v2 = vpack.c.bf16 %v763_v21, %v762_v59  ;;  %v981_v48 = vunpack.c.h.b16 %v787_v46  ;;  %v984_v10 = vunpack.c.h.b16 %v789_v52  ;;  %v743_v13 = vmul.f32 %v1966_v5, %v2356_v7 }
  0xca   : > { %v877_v61 = vrot.slane %v874_v55, 6  ;;  %v986_v1 = vpack.c.b16 %v983_v42, %v980_v58  ;;  %v691_v17 = vpack.c.bf16 %v686_v57, %v685_v39  ;;  %v746_v18 = vmul.f32 %v1966_v5, %v2288_v36 }
  0xcb   : > { %v930_v8 = vunpack.c.l.b16 %v768_v2  ;;  %v987_v14 = vpack.c.b16 %v984_v10, %v981_v48  ;;  %v1951_v60 = vunpack.i.l.bf16 %v2334_v35  ;;  %v702_v7 = vunpack.c.l.bf16 %v697_v49 }
  0xcc   : > { %824 = vrot.lane.b32.xlu2 %v819_v9, %s2076_s16  ;;  %v739_v9 = vsel %vm738_vm8, %v1966_v5, %v2325_v12  ;;  %v931_v12 = vunpack.c.h.b16 %v768_v2  ;;  %v833_v20 = vunpack.c.l.b16 %v691_v17  ;;  %v834_v4 = vunpack.c.h.b16 %v691_v17 }
  0xcd   : > { %v744_v11 = vmul.f32 %v739_v9, %v729_v15  ;;  %v936_v16 = vpack.c.b16 %v930_v8, %v930_v8  ;;  %v747_v25 = vmul.f32 %v739_v9, %v2292_v40  ;;  %v703_v15 = vunpack.c.h.bf16 %v697_v49 }
  0xce   : > { %969 = vrot.lane.b32.xlu1 %v965_v44, %s2704_s21  ;;  %v710_v23 = vsel %vm709_vm9, %v1951_v60, %v2342_v54  ;;  %v937_v24 = vpack.c.b16 %v931_v12, %v931_v12  ;;  %v839_v40 = vpack.c.b16 %v833_v20, %v833_v20  ;;  %v714_v27 = vmul.f32 %v1951_v60, %v2349_v63 }
  0xcf   : > { %967 = vrot.lane.b32.xlu0 %v964_v45, %s2704_s21  ;;  %v749_v19 = vpack.c.bf16 %v744_v11, %v743_v13  ;;  %v751_v22 = vpack.c.bf16 %v747_v25, %v746_v18  ;;  %v715_v6 = vmul.f32 %v710_v23, %v2347_v41  ;;  %v717_v28 = vmul.f32 %v1951_v60, %v702_v7  ;;  %s2720_s21 = smov 15  }
  0xd0   : > { %v718_v29 = vmul.f32 %v710_v23, %v703_v15  ;;  %v840_v33 = vpack.c.b16 %v834_v4, %v834_v4 }
  0xd1   : > { %v905_v36 = vunpack.c.l.b16 %v749_v19  ;;  %v908_v35 = vunpack.c.l.b16 %v751_v22  ;;  %v720_v31 = vpack.c.bf16 %v715_v6, %v714_v27  ;;  %v909_v41 = vunpack.c.h.b16 %v751_v22 }
  0xd2   : > { %v722_v3 = vpack.c.bf16 %v718_v29, %v717_v28 }
  0xd3   : > { %v911_v30 = vpack.c.b16 %v908_v35, %v905_v36  ;;  %v866_v37 = vunpack.c.l.b16 %v720_v31  ;;  %v867_v51 = vunpack.c.h.b16 %v720_v31 }
  0xd4   : > { %849 = vrot.lane.b32.xlu2 %v841_v34, %s2084_s30  ;;  %v906_v34 = vunpack.c.h.b16 %v749_v19  ;;  %v869_v63 = vunpack.c.l.b16 %v722_v3  ;;  %v870_v52 = vunpack.c.h.b16 %v722_v3 }
  0xd5   : > { %v914_v54 = vrot.slane %v911_v30, 2 }
  0xd6   : > { %822 = vrot.lane.b32.xlu1 %v818_v0, %s2076_s16  ;;  %v912_v44 = vpack.c.b16 %v909_v41, %v906_v34  ;;  %v872_v45 = vpack.c.b16 %v869_v63, %v866_v37  ;;  %v873_v53 = vpack.c.b16 %v870_v52, %v867_v51  ;;  %v610_v41 = vld [vmem:[#allocation2 + $0x8] sm:$0xf]  ;;  %v612_v63 = vld [vmem:[#allocation2 + $0x18] sm:$0x3] }
  0xd7   : > { %989 = vrot.lane.b32.xlu0 %v986_v1, %s2706_s23 }
  0xd8   : > { %v915_v46 = vrot.slane %v912_v44, 2  ;;  %v875_v47 = vrot.slane %v872_v45, 6  ;;  %v876_v55 = vrot.slane %v873_v53, 6  ;;  %v625_v44 = vunpack.c.l.bf16 %v610_v41 }
  0xd9   : > { %v628_v45 = vunpack.c.l.bf16 %v612_v63 }
  0xdc   : > { %882 = vrot.lane.b32.xlu2 %v877_v61, %s2702_s2 }
  0xde   : > { %991 = vrot.lane.b32.xlu1 %v987_v14, %s2706_s23  ;;  %s2719_s23 = smov 113  }
  0xdf   : > { %942 = vrot.lane.b32.xlu0 %v936_v16, %s2708_s24 }
  0xe6   : > { %944 = vrot.lane.b32.xlu1 %v937_v24, %s2708_s24  ;;  %s2718_s24 = smov 1  }
  0xe7   : > { %845 = vrot.lane.b32.xlu0 %v839_v40, %s2084_s30 }
  0xee   : > { %847 = vrot.lane.b32.xlu1 %v840_v33, %s2084_s30 }
  0xef   : > { %917 = vrot.lane.b32.xlu0 %v914_v54, %s2085_s22 }
  0xf6   : > { %919 = vrot.lane.b32.xlu1 %v915_v46, %s2085_s22 }
  0xf7   : > { %878 = vrot.lane.b32.xlu0 %v875_v47, %s2702_s2 }
  0xfc   : > { %v953_v56 = vpop.permute.xlu2 %952 }
  0xfe   : > { %880 = vrot.lane.b32.xlu1 %v876_v55, %s2702_s2  ;;  %v644_v55 = vmul.f32 %v2337_v50, %v625_v44  ;;  %s2723_s2 = smov 95  }
 0x104   : > { %v947_v58 = vpop.permute.xlu2 %946 }
 0x10c   : > { %v994_v59 = vpop.permute.xlu2 %993 }
 0x114   : > { %v856_v61 = vpop.permute.xlu2 %855 }
 0x11e   : > { %v922_v48 = vpop.permute.xlu2 %921 }
 0x126   : > { %v2423_v17 = vpop.permute.xlu2 %824 }
 0x128   : > { %v951_v21 = vpop.permute.xlu1 %950 }
 0x129   : > { %v949_v42 = vpop.permute.xlu0 %948  ;;  %v958_v57 = vsel %vm954_vm11, %v951_v21, %v953_v56  ;;  %v647_v56 = vmul.f32 %v2337_v50, %v628_v45 }
 0x12a   : > { %v957_v13 = vsel %vm954_vm11, %v949_v42, %v951_v21 }
 0x130   : > { %v854_v0 = vpop.permute.xlu1 %853 }
 0x131   : > { %v852_v1 = vpop.permute.xlu0 %851  ;;  %v2408_v2 = vsel %vm857_vm10, %v854_v0, %v856_v61 }
 0x132   : > { %v2411_v5 = vsel %vm857_vm10, %v852_v1, %v854_v0 }
 0x138   : > { %v2413_v8 = vpop.permute.xlu1 %897 }
 0x139   : > { %v2415_v39 = vpop.permute.xlu0 %895 }
 0x13a   : > { %v900_v46 = vsel %vm637_vm6, %v2415_v39, %v2413_v8 }
 0x140   : > { %v970_v9 = vpop.permute.xlu1 %969 }
 0x141   : > { %v968_v10 = vpop.permute.xlu0 %967  ;;  %v975_v11 = vsel %vm973_vm12, %v970_v9, %v2263_v62  ;;  %v850_v62 = vpop.permute.xlu2 %849 }
 0x142   : > { %v974_v14 = vsel %vm973_vm12, %v968_v10, %v970_v9  ;;  %v1042_v16 = vsel %vm1015_vm13, %v949_v42, %v968_v10  ;;  %v1048_v18 = vsel %vm1015_vm13, %v958_v57, %v975_v11  ;;  %v649_v42 = vpack.c.bf16 %v644_v55, %v644_v55  ;;  %v1181_v10 = vld [vmem:[%s2692_s7] sm:$0xf] }
 0x143   : > { %1098 = vrot.lane.b32.xlu0 %v1042_v16, %s2080_s20  ;;  %v1045_v25 = vsel %vm1015_vm13, %v957_v13, %v974_v14  ;;  %1102 = vrot.lane.b32.xlu2 %v1048_v18, %s2080_s20  ;;  %v1014_v0 = vsel %vm1008_vm15, %v2423_v17, %v850_v62 }
 0x144   : > { %1100 = vrot.lane.b32.xlu1 %v1045_v25, %s2080_s20  ;;  %v797_v50 = vunpack.c.l.b16 %v649_v42 }
 0x148   : > { %v823_v49 = vpop.permute.xlu1 %822 }
 0x149   : > { %v990_v60 = vpop.permute.xlu0 %989  ;;  %v883_v15 = vpop.permute.xlu2 %882  ;;  %v827_v40 = vsel %vm709_vm9, %v2286_v32, %v823_v49  ;;  %v828_v27 = vsel %vm709_vm9, %v823_v49, %v2423_v17 }
 0x14a   : > { %v1024_v23 = vsel %vm1015_vm13, %v856_v61, %v883_v15  ;;  %v651_v61 = vpack.c.bf16 %v647_v56, %v647_v56  ;;  %v1001_v9 = vsel %vm998_vm5, %v2372_v26, %v827_v40 }
 0x14b   : > { %1104 = vrot.lane.b32.xlu0 %v990_v60, %s2080_s20 }
 0x150   : > { %v992_v19 = vpop.permute.xlu1 %991 }
 0x151   : > { %v997_v12 = vsel %vm995_vm14, %v992_v19, %v994_v59  ;;  %v996_v20 = vsel %vm995_vm14, %v990_v60, %v992_v19  ;;  %v943_v7 = vpop.permute.xlu0 %942 }
 0x152   : > { %1108 = vrot.lane.b32.xlu2 %v997_v12, %s2080_s20  ;;  %1106 = vrot.lane.b32.xlu1 %v996_v20, %s2080_s20 }
 0x158   : > { %v945_v22 = vpop.permute.xlu1 %944 }
 0x159   : > { %v846_v36 = vpop.permute.xlu0 %845  ;;  %v955_v32 = vsel %vm954_vm11, %v943_v7, %v945_v22  ;;  %v956_v31 = vsel %vm954_vm11, %v945_v22, %v947_v58 }
 0x15a   : > { %1084 = vrot.lane.b32.xlu2 %v1024_v23, %s2080_s20 }
 0x160   : > { %v848_v24 = vpop.permute.xlu1 %847 }
 0x161   : > { %v858_v6 = vsel %vm857_vm10, %v846_v36, %v848_v24  ;;  %v859_v28 = vsel %vm857_vm10, %v848_v24, %v850_v62  ;;  %v918_v4 = vpop.permute.xlu0 %917  ;;  %v1203_v36 = vld [vmem:[#allocation1] sm:$0xff] }
 0x162   : > { %v1012_v29 = vsel %vm1008_vm15, %v828_v27, %v859_v28  ;;  %v1010_v35 = vsel %vm1008_vm15, %v827_v40, %v858_v6  ;;  %v1035_v34 = vsel %vm1008_vm15, %v918_v4, %v943_v7  ;;  %v1027_v51 = vsel %vm998_vm5, %v2415_v39, %v918_v4 }
 0x163   : > { %1076 = vrot.lane.b32.xlu1 %v1012_v29, %s2080_s20  ;;  %1074 = vrot.lane.b32.xlu0 %v1010_v35, %s2080_s20  ;;  %v1205_v6 = vpack.i.b16 %v1203_v36, %v1203_v36 }
 0x165   : > { %v1207_v35 = vperm.slane %v1205_v6, 0 }
 0x168   : > { %v920_v30 = vpop.permute.xlu1 %919 }
 0x169   : > { %v924_v3 = vsel %vm923_vm0, %v918_v4, %v920_v30  ;;  %v925_v33 = vsel %vm923_vm0, %v920_v30, %v922_v48  ;;  %v879_v58 = vpop.permute.xlu0 %878  ;;  %v1213_v30 = vunpack.c.l.bf16 %v1207_v35 }
 0x16a   : > { %v1039_v54 = vsel %vm1008_vm15, %v925_v33, %v956_v31  ;;  %v1037_v37 = vsel %vm1008_vm15, %v924_v3, %v955_v32  ;;  %v1033_v47 = vsel %vm998_vm5, %v2413_v8, %v925_v33  ;;  %v1030_v52 = vsel %vm998_vm5, %v900_v46, %v924_v3 }
 0x16b   : > { %1096 = vrot.lane.b32.xlu2 %v1039_v54, %s2080_s20  ;;  %1092 = vrot.lane.b32.xlu0 %v1035_v34, %s2080_s20  ;;  %v800_v8 = vunpack.c.l.b16 %v651_v61 }
 0x16c   : > { %1094 = vrot.lane.b32.xlu1 %v1037_v37, %s2080_s20 }
 0x16d   : > { %v803_v39 = vpack.c.b16 %v800_v8, %v797_v50 }
 0x16f   : > { %v1007_v57 = vsel %vm998_vm5, %v803_v39, %v2423_v17 }
 0x170   : > { %v881_v53 = vpop.permute.xlu1 %880 }
 0x171   : > { %v885_v59 = vsel %vm884_vm1, %v879_v58, %v881_v53  ;;  %v886_v21 = vsel %vm884_vm1, %v881_v53, %v883_v15  ;;  %v1204_v15 = vld [vmem:[#allocation1 + $0x9] sm:$0xff]  ;;  %v1049_v58 = vld [vmem:[%s2690_s5] sm:$0x3] }
 0x172   : > { %v1018_v1 = vsel %vm1015_vm13, %v2411_v5, %v885_v59  ;;  %v1021_v48 = vsel %vm1015_vm13, %v2408_v2, %v886_v21  ;;  %v1004_v5 = vsel %vm998_vm5, %v2370_v38, %v828_v27  ;;  %v1173_v2 = vld [vmem:[%s2691_s6] sm:$0xf]  ;;  %v1208_v24 = vpack.i.b16 %v1204_v15, %v1204_v15 }
 0x173   : > { %1090 = vrot.lane.b32.xlu2 %v1033_v47, %s2080_s20  ;;  %1086 = vrot.lane.b32.xlu0 %v1027_v51, %s2080_s20 }
 0x174   : > { %1088 = vrot.lane.b32.xlu1 %v1030_v52, %s2080_s20  ;;  %v1210_v28 = vperm.slane %v1208_v24, 0 }
 0x176   : > { %v1214_v4 = vunpack.c.l.bf16 %v1210_v28 }
 0x178   : > { %v1217_v32 = vrot.slane %v1214_v4, 4 }
 0x17a   : > { %v2505_v33 = vsel %vm1008_vm15, %v1213_v30, %v1217_v32 }
 0x17b   : > { %1078 = vrot.lane.b32.xlu2 %v1014_v0, %s2080_s20  ;;  %1080 = vrot.lane.b32.xlu0 %v1018_v1, %s2080_s20 }
 0x17c   : > { %1082 = vrot.lane.b32.xlu1 %v1021_v48, %s2080_s20 }
 0x183   : > { %1072 = vrot.lane.b32.xlu2 %v1007_v57, %s2080_s20  ;;  %1068 = vrot.lane.b32.xlu0 %v1001_v9, %s2080_s20 }
 0x184   : > { %1070 = vrot.lane.b32.xlu1 %v1004_v5, %s2080_s20 }
 0x18b   : > { %1176 = vperm.xlu0 %1941, %v1173_v2   ;;  %1219 = vrot.lane.b32.xlu2 %v2505_v33, %s2079_s15 }
 0x18c   : > { %1184 = vperm.xlu1 %1942, %v1181_v10  }
 0x194   : > { %1282 = vrot.lane.b32.xlu1 %v2505_v33, %s2076_s16 }
 0x19d   : > { %v1103_v13 = vpop.permute.xlu2 %1102 }
 0x1ac   : > { %v1109_v14 = vpop.permute.xlu2 %1108 }
 0x1b4   : > { %v1085_v19 = vpop.permute.xlu2 %1084 }
 0x1b5   : > { %v1099_v26 = vpop.permute.xlu0 %1098 }
 0x1b6   : > { %v1101_v11 = vpop.permute.xlu1 %1100 }
 0x1b7   : > { %v1121_v60 = vsel %vm776_vm7, %v1099_v26, %v1101_v11  ;;  %v1122_v62 = vsel %vm776_vm7, %v1101_v11, %v1103_v13 }
 0x1bd   : > { %v1105_v16 = vpop.permute.xlu0 %1104 }
 0x1c4   : > { %v1107_v38 = vpop.permute.xlu1 %1106 }
 0x1c5   : > { %v1123_v17 = vsel %vm776_vm7, %v1105_v16, %v1107_v38  ;;  %v1124_v18 = vsel %vm776_vm7, %v1107_v38, %v1109_v14  ;;  %v1097_v7 = vpop.permute.xlu2 %1096 }
 0x1c6   : > { %v1142_v25 = vsel %vm998_vm5, %v1123_v17, 0  ;;  %v1145_v49 = vsel %vm998_vm5, %v1124_v18, 0 }
 0x1c7   : > { %1148 = vmatpush.bf16.msra.mxu2 %v1142_v25  ;;  %1161 = vmatpush.bf16.msra.mxu3 %v1145_v49 }
 0x1cb   : > { %1149 = vmatpush.bf16.msra.mxu2 %v1121_v60  ;;  %1162 = vmatpush.bf16.msra.mxu3 %v1122_v62 }
 0x1cd   : > { %v1091_v29 = vpop.permute.xlu2 %1090 }
 0x1d5   : > { %v1077_v12 = vpop.permute.xlu1 %1076  ;;  %v1075_v20 = vpop.permute.xlu0 %1074 }
 0x1d6   : > { %v1079_v37 = vpop.permute.xlu2 %1078  ;;  %v1113_v46 = vsel %vm776_vm7, %v1075_v20, %v1077_v12 }
 0x1d7   : > { %v1114_v47 = vsel %vm776_vm7, %v1077_v12, %v1079_v37 }
 0x1dd   : > { %v1093_v23 = vpop.permute.xlu0 %1092 }
 0x1de   : > { %v1095_v22 = vpop.permute.xlu1 %1094  ;;  %v1073_v51 = vpop.permute.xlu2 %1072 }
 0x1df   : > { %v1119_v40 = vsel %vm776_vm7, %v1093_v23, %v1095_v22  ;;  %v1120_v27 = vsel %vm776_vm7, %v1095_v22, %v1097_v7 }
 0x1e0   : > { %1150 = vmatpush.bf16.msra.mxu2 %v1119_v40  ;;  %1163 = vmatpush.bf16.msra.mxu3 %v1120_v27 }
 0x1e5   : > { %v1087_v3 = vpop.permute.xlu0 %1086 }
 0x1e6   : > { %v1089_v31 = vpop.permute.xlu1 %1088  ;;  %v1220_v26 = vpop.permute.xlu2 %1219 }
 0x1e7   : > { %v1117_v54 = vsel %vm776_vm7, %v1087_v3, %v1089_v31  ;;  %v1118_v34 = vsel %vm776_vm7, %v1089_v31, %v1091_v29  ;;  %v1221_v13 = vrot.slane %v1220_v26, 4 }
 0x1e8   : > { %1151 = vmatpush.bf16.msra.mxu2 %v1117_v54  ;;  %1164 = vmatpush.bf16.msra.mxu3 %v1118_v34 }
 0x1e9   : > { %v1222_v38 = vsel %vm637_vm6, %v1221_v13, %v1220_v26 }
 0x1ed   : > { %v1081_v63 = vpop.permute.xlu0 %1080 }
 0x1ee   : > { %v1083_v41 = vpop.permute.xlu1 %1082 }
 0x1ef   : > { %v1115_v44 = vsel %vm776_vm7, %v1081_v63, %v1083_v41  ;;  %v1116_v45 = vsel %vm776_vm7, %v1083_v41, %v1085_v19 }
 0x1f0   : > { %1152 = vmatpush.bf16.msra.mxu2 %v1115_v44  ;;  %1165 = vmatpush.bf16.msra.mxu3 %v1116_v45 }
 0x1f4   : > { %1153 = vmatpush.bf16.msra.mxu2 %v1113_v46  ;;  %1166 = vmatpush.bf16.msra.mxu3 %v1114_v47 }
 0x1f5   : > { %v1069_v53 = vpop.permute.xlu0 %1068 }
 0x1f6   : > { %v1071_v52 = vpop.permute.xlu1 %1070 }
 0x1f7   : > { %v1111_v55 = vsel %vm776_vm7, %v1069_v53, %v1071_v52  ;;  %v1112_v56 = vsel %vm776_vm7, %v1071_v52, %v1073_v51 }
 0x1f8   : > { %1154 = vmatpush.bf16.msra.mxu2 %v1111_v55  ;;  %1167 = vmatpush.bf16.msra.mxu3 %v1112_v56 }
 0x1fb   : > { %1849 = vmatmul.msk.bf16.vlgmr.msra.gmra.mxu2 %vm1137_vm2, %v1049_v58  ;;  %1850 = vmatmul.msk.bf16.vlgmr.msra.gmra.mxu3 %vm1137_vm2, %v1049_v58 }
 0x1fd   : > { %v1177_v59 = vpop.permute.xlu0 %1176 }
 0x1fe   : > { %v1185_v1 = vpop.permute.xlu1 %1184 }
 0x206   : > { %v1283_v29 = vpop.permute.xlu1 %1282 }
 0x207   : > { %v1284_v31 = vrot.slane %v1283_v29, 4 }
 0x27e   : > { %v1156_v21 = vpop.f32.mrf.mxu2  ;;  %v1169_v42 = vpop.f32.mrf.mxu3 }
 0x27f   : > { %v1179_v61 = vmul.f32 %v1177_v59, %v1156_v21  ;;  %v1180_v0 = vmul.f32 %v1177_v59, %v1169_v42 }
 0x281   : > { %v1187_v48 = vadd.f32 %v1185_v1, %v1179_v61  ;;  %v1188_v50 = vadd.f32 %v1185_v1, %v1180_v0 }
 0x283   : > { %v1189_v8 = vmax.f32 %v1187_v48, 0.0  ;;  %v1190_v39 = vmax.f32 %v1188_v50, 0.0 }
 0x285   : > { %v1193_v57 = vpack.c.bf16 %v1190_v39, %v1189_v8 }
 0x286   : > { %v1158_v9 = vpop.f32.mrf.mxu2  ;;  %v1171_v5 = vpop.f32.mrf.mxu3 }
 0x287   : > { %v1195_v2 = vrot.slane %v1193_v57, 2 }
 0x289   : > { %v1198_v10 = vsel %vm1015_vm13, %v1193_v57, %v1195_v2 }
 0x28a   : > { %1200 = vst [vmem:[#allocation3 + $0x2] sm:$0xf] %v1198_v10 }
 0x291   : > { %v1201_v11 = vld [vmem:[#allocation3] sm:$0x3f] }
 0x292   : > { %v1211_v14 = vunpack.c.l.bf16 %v1201_v11  ;;  %v1212_v16 = vunpack.c.h.bf16 %v1201_v11  ;;  %v1279_v30 = vld [vmem:[#allocation3] sm:$0x3f] }
 0x293   : > { %v1281_v3 = vunpack.c.h.bf16 %v1279_v30  ;;  %v1280_v54 = vunpack.c.l.bf16 %v1279_v30  ;;  %v1304_v46 = vld [vmem:[#allocation3 + $0x2] sm:$0x3f] }
 0x294   : > { %v1225_v17 = vmul.f32 %v1222_v38, %v1211_v14  ;;  %v1226_v18 = vmul.f32 %v1221_v13, %v1212_v16  ;;  %v1306_v55 = vunpack.c.h.bf16 %v1304_v46  ;;  %v1305_v61 = vunpack.c.l.bf16 %v1304_v46  ;;  %v1328_v39 = vld [vmem:[#allocation3 + $0x2] sm:$0x3f] }
 0x295   : > { %v1289_v34 = vmul.f32 %v1284_v31, %v1281_v3  ;;  %v1330_v2 = vunpack.c.h.bf16 %v1328_v39  ;;  %v1329_v13 = vunpack.c.l.bf16 %v1328_v39  ;;  %v2554_v16 = vld [vmem:[#allocation3 + $0x2] sm:$0x3f] }
 0x296   : > { %1229 = vst [vmem:[#allocation1] ss:$2 sm:$0xff] %v1225_v17 }
 0x297   : > { %1231 = vst [vmem:[#allocation1 + $0x10] ss:$2 sm:$0xff] %v1226_v18 }
 0x29d   : > { %v2524_v25 = vld.sshfl [vmem:[#allocation1] sm:$0xff pattern:$0x75316420]  ;;  %v2526_v49 = vld.sshfl [vmem:[#allocation1 + $0x8] sm:$0xff pattern:$0x75316420] }
 0x29e   : > { %v2528_v60 = vld.sshfl [vmem:[#allocation1 + $0x10] sm:$0xff pattern:$0x75316420] }
 0x29f   : > { %1241 = vst [vmem:[#allocation1] ss:$9 sm:$0xff] %v2254_v43  ;;  %v2537_v43 = vld [vmem:[#allocation3] sm:$0x3f] }
 0x2a0   : > { %v1251_v27 = vunpack.c.h.bf16 %v2537_v43  ;;  %v1250_v28 = vunpack.c.l.bf16 %v2537_v43 }
 0x2a6   : > { %v1243_v62 = vld [vmem:[#allocation1 + $0x9] sm:$0xff]  ;;  %v1242_v19 = vld [vmem:[#allocation1] sm:$0xff] }
 0x2a7   : > { %v1244_v12 = vpack.i.b16 %v1242_v19, %v1242_v19  ;;  %v1247_v20 = vpack.i.b16 %v1243_v62, %v1243_v62 }
 0x2a9   : > { %v1246_v7 = vperm.slane %v1244_v12, 0  ;;  %v1249_v15 = vperm.slane %v1247_v20, 0 }
 0x2ab   : > { %v1253_v22 = vunpack.c.l.bf16 %v1249_v15  ;;  %v1252_v23 = vunpack.c.l.bf16 %v1246_v7  ;;  %v1354_v7 = vunpack.c.h.bf16 %v2554_v16 }
 0x2ad   : > { %v1256_v36 = vrot.slane %v1253_v22, 4 }
 0x2af   : > { %v1257_v24 = vsel %vm1008_vm15, %v1252_v23, %v1256_v36  ;;  %v1353_v36 = vunpack.c.l.bf16 %v2554_v16 }
 0x2b0   : > { %1355 = vrot.lane.b32.xlu1 %v1257_v24, %s2080_s20  ;;  %1307 = vrot.lane.b32.xlu2 %v1257_v24, %s2718_s24  ;;  %s2023_s24 = scalar_lea.hbm %s2698_s13, 16 }
 0x2b1   : > { %1258 = vrot.lane.b32.xlu0 %v1257_v24, %s2719_s23 }
 0x2b9   : > { %1331 = vrot.lane.b32.xlu0 %v2505_v33, %s2720_s21  ;;  %v1285_v33 = vsel %vm709_vm9, %v1284_v31, %v1283_v29 }
 0x2ba   : > { %v1288_v63 = vmul.f32 %v1285_v33, %v1280_v54 }
 0x30a   : > { %v1308_v37 = vpop.permute.xlu2 %1307 }
 0x30b   : > { %v1309_v47 = vrot.slane %v1308_v37, 4 }
 0x30d   : > { %v1310_v21 = vsel %vm738_vm8, %v1309_v47, %v1308_v37  ;;  %v1314_v0 = vmul.f32 %v1309_v47, %v1306_v55 }
 0x30e   : > { %v1313_v8 = vmul.f32 %v1310_v21, %v1305_v61 }
 0x322   : > { %v1356_v10 = vpop.permute.xlu1 %1355 }
 0x323   : > { %v1259_v40 = vpop.permute.xlu0 %1258  ;;  %v1357_v38 = vrot.slane %v1356_v10, 4 }
 0x324   : > { %v1260_v6 = vrot.slane %v1259_v40, 4 }
 0x325   : > { %v1358_v24 = vsel %vm776_vm7, %v1357_v38, %v1356_v10 }
 0x326   : > { %v1261_v35 = vsel %vm680_vm4, %v1260_v6, %v1259_v40  ;;  %v1265_v4 = vmul.f32 %v1260_v6, %v1251_v27  ;;  %v1362_v40 = vmul.f32 %v1357_v38, %v1354_v7  ;;  %vm1631_vm4 = vcmask 293888  }
 0x327   : > { %v1264_v32 = vmul.f32 %v1261_v35, %v1250_v28  ;;  %v1361_v35 = vmul.f32 %v1358_v24, %v1353_v36 }
 0x328   : > { %1270 = vst [vmem:[#allocation1 + $0x10] ss:$2 sm:$0xff] %v1265_v4 }
 0x329   : > { %1268 = vst [vmem:[#allocation1] ss:$2 sm:$0xff] %v1264_v32 }
 0x32b   : > { %v1332_v42 = vpop.permute.xlu0 %1331 }
 0x32c   : > { %v1333_v57 = vrot.slane %v1332_v42, 4 }
 0x32e   : > { %v1334_v26 = vsel %vm757_vm3, %v1333_v57, %v1332_v42  ;;  %v1338_v11 = vmul.f32 %v1333_v57, %v1330_v2  ;;  %vm1561_vm3 = vcmask 97280  }
 0x32f   : > { %v1273_v41 = vld.sshfl [vmem:[#allocation1 + $0x10] sm:$0xff pattern:$0x75316420]  ;;  %v1337_v17 = vmul.f32 %v1334_v26, %v1329_v13 }
 0x330   : > { %v1278_v44 = vpack.c.bf16 %v1273_v41, %v1273_v41  ;;  %1294 = vst [vmem:[#allocation1 + $0x10] ss:$2 sm:$0xff] %v1289_v34  ;;  %v1271_v45 = vld.sshfl [vmem:[#allocation1] sm:$0xff pattern:$0x75316420] }
 0x331   : > { %v1272_v51 = vld.sshfl [vmem:[#allocation1 + $0x8] sm:$0xff pattern:$0x75316420] }
 0x332   : > { %v1405_v52 = vunpack.c.l.b16 %v1278_v44  ;;  %v1277_v53 = vpack.c.bf16 %v1272_v51, %v1271_v45  ;;  %1292 = vst [vmem:[#allocation1] ss:$2 sm:$0xff] %v1288_v63 }
 0x334   : > { %v1408_v56 = vpack.c.b16 %v1405_v52, %v1405_v52  ;;  %v1404_v58 = vunpack.c.h.b16 %v1277_v53  ;;  %v1403_v59 = vunpack.c.l.b16 %v1277_v53 }
 0x336   : > { %1413 = vrot.lane.b32.xlu2 %v1408_v56, %s2084_s30  ;;  %v1407_v1 = vpack.c.b16 %v1404_v58, %v1404_v58  ;;  %v1406_v48 = vpack.c.b16 %v1403_v59, %v1403_v59 }
 0x337   : > { %v2545_v50 = vld.sshfl [vmem:[#allocation1 + $0x10] sm:$0xff pattern:$0x75316420] }
 0x338   : > { %1319 = vst [vmem:[#allocation1 + $0x10] ss:$2 sm:$0xff] %v1314_v0  ;;  %1411 = vrot.lane.b32.xlu1 %v1407_v1, %s2084_s30  ;;  %1409 = vrot.lane.b32.xlu0 %v1406_v48, %s2084_s30  ;;  %s2721_s30 = smov 96   ;;  %v1303_v0 = vld [vmem:[#allocation3 + $0x2] sm:$0xf]  ;;  %v1302_v2 = vpack.c.bf16 %v2545_v50, %v2545_v50 }
 0x339   : > { %v2549_v9 = vld.sshfl [vmem:[#allocation1] sm:$0xff pattern:$0x75316420]  ;;  %v2551_v5 = vld.sshfl [vmem:[#allocation1 + $0x8] sm:$0xff pattern:$0x75316420] }
 0x33a   : > { %1317 = vst [vmem:[#allocation1] ss:$2 sm:$0xff] %v1313_v8  ;;  %v1301_v8 = vpack.c.bf16 %v2551_v5, %v2549_v9 }
 0x33c   : > { %v1420_v39 = vunpack.c.h.b16 %v1301_v8  ;;  %v1419_v26 = vunpack.c.l.b16 %v1301_v8 }
 0x33e   : > { %v1423_v10 = vpack.c.b16 %v1420_v39, %v1420_v39  ;;  %v1422_v9 = vpack.c.b16 %v1419_v26, %v1419_v26 }
 0x33f   : > { %v1322_v14 = vld.sshfl [vmem:[#allocation1 + $0x10] sm:$0xff pattern:$0x75316420] }
 0x340   : > { %v1327_v18 = vpack.c.bf16 %v1322_v14, %v1322_v14  ;;  %1343 = vst [vmem:[#allocation1 + $0x10] ss:$2 sm:$0xff] %v1338_v11  ;;  %v1421_v11 = vunpack.c.l.b16 %v1302_v2  ;;  %v1425_v38 = vrot.slane %v1422_v9, 2 }
 0x341   : > { %v1320_v62 = vld.sshfl [vmem:[#allocation1] sm:$0xff pattern:$0x75316420]  ;;  %v1321_v19 = vld.sshfl [vmem:[#allocation1 + $0x8] sm:$0xff pattern:$0x75316420] }
 0x342   : > { %v1451_v12 = vunpack.c.l.b16 %v1327_v18  ;;  %v1326_v20 = vpack.c.bf16 %v1321_v19, %v1320_v62  ;;  %1341 = vst [vmem:[#allocation1] ss:$2 sm:$0xff] %v1337_v17  ;;  %v1424_v5 = vpack.c.b16 %v1421_v11, %v1421_v11 }
 0x344   : > { %v1454_v15 = vpack.c.b16 %v1451_v12, %v1451_v12  ;;  %v1450_v22 = vunpack.c.h.b16 %v1326_v20  ;;  %v1449_v23 = vunpack.c.l.b16 %v1326_v20  ;;  %v1427_v17 = vrot.slane %v1424_v5, 2 }
 0x346   : > { %v1457_v27 = vrot.slane %v1454_v15, 6  ;;  %v1453_v6 = vpack.c.b16 %v1450_v22, %v1450_v22  ;;  %v1452_v28 = vpack.c.b16 %v1449_v23, %v1449_v23 }
 0x347   : > { %v1346_v29 = vld.sshfl [vmem:[#allocation1 + $0x10] sm:$0xff pattern:$0x75316420] }
 0x348   : > { %1462 = vrot.lane.b32.xlu0 %v1457_v27, %s2085_s22  ;;  %v1456_v4 = vrot.slane %v1453_v6, 6  ;;  %v1455_v30 = vrot.slane %v1452_v28, 6  ;;  %v1351_v32 = vpack.c.bf16 %v1346_v29, %v1346_v29  ;;  %1367 = vst [vmem:[#allocation1 + $0x10] ss:$2 sm:$0xff] %v1362_v40 }
 0x349   : > { %v1344_v31 = vld.sshfl [vmem:[#allocation1] sm:$0xff pattern:$0x75316420]  ;;  %v1345_v3 = vld.sshfl [vmem:[#allocation1 + $0x8] sm:$0xff pattern:$0x75316420] }
 0x34a   : > { %1460 = vrot.lane.b32.xlu2 %v1456_v4, %s2085_s22  ;;  %1458 = vrot.lane.b32.xlu1 %v1455_v30, %s2085_s22  ;;  %v1470_v54 = vunpack.c.l.b16 %v1351_v32  ;;  %v1350_v33 = vpack.c.bf16 %v1345_v3, %v1344_v31  ;;  %1365 = vst [vmem:[#allocation1] ss:$2 sm:$0xff] %v1361_v35  ;;  %s2722_s22 = smov 94   ;;  %v1238_v4 = vpack.c.bf16 %v2526_v49, %v2524_v25 }
 0x34b   : > { %v1239_v25 = vpack.c.bf16 %v2528_v60, %v2528_v60 }
 0x34c   : > { %v1469_v34 = vunpack.c.h.b16 %v1350_v33  ;;  %v1468_v37 = vunpack.c.l.b16 %v1350_v33  ;;  %v1473_v41 = vpack.c.b16 %v1470_v54, %v1470_v54 }
 0x34e   : > { %v1472_v44 = vpack.c.b16 %v1469_v34, %v1469_v34  ;;  %v1471_v45 = vpack.c.b16 %v1468_v37, %v1468_v37 }
 0x34f   : > { %v1370_v63 = vld.sshfl [vmem:[#allocation1 + $0x10] sm:$0xff pattern:$0x75316420] }
 0x350   : > { %1478 = vrot.lane.b32.xlu0 %v1473_v41, %s2721_s30  ;;  %v1375_v46 = vpack.c.bf16 %v1370_v63, %v1370_v63  ;;  %v1379_v41 = vunpack.c.h.b16 %v1238_v4 }
 0x351   : > { %v1368_v47 = vld.sshfl [vmem:[#allocation1] sm:$0xff pattern:$0x75316420]  ;;  %v1369_v51 = vld.sshfl [vmem:[#allocation1 + $0x8] sm:$0xff pattern:$0x75316420] }
 0x352   : > { %1476 = vrot.lane.b32.xlu2 %v1472_v44, %s2721_s30  ;;  %1474 = vrot.lane.b32.xlu1 %v1471_v45, %s2721_s30  ;;  %v1374_v52 = vpack.c.bf16 %v1369_v51, %v1368_v47  ;;  %1386 = vst [vmem:[#allocation1 + $0x1] ss:$4 sm:$0xff] %v2537_v43  ;;  %v1503_v56 = vunpack.c.l.b16 %v1375_v46 }
 0x354   : > { %v1502_v53 = vunpack.c.h.b16 %v1374_v52  ;;  %v1501_v55 = vunpack.c.l.b16 %v1374_v52  ;;  %v1506_v21 = vpack.c.b16 %v1503_v56, %v1503_v56  ;;  %v1378_v56 = vunpack.c.l.b16 %v1238_v4 }
 0x356   : > { %v1505_v58 = vpack.c.b16 %v1502_v53, %v1502_v53  ;;  %v1504_v59 = vpack.c.b16 %v1501_v55, %v1501_v55  ;;  %v1382_v53 = vpack.c.b16 %v1379_v41, %v1379_v41  ;;  %v1380_v55 = vunpack.c.l.b16 %v1239_v25 }
 0x357   : > { %v1381_v39 = vpack.c.b16 %v1378_v56, %v1378_v56 }
 0x358   : > { %1509 = vrot.lane.b32.xlu0 %v1505_v58, %s2722_s22  ;;  %v1383_v8 = vpack.c.b16 %v1380_v55, %v1380_v55 }
 0x359   : > { %v1387_v42 = vld.sshfl [vmem:[#allocation1] sm:$0xff pattern:$0x73625140]  ;;  %v1391_v61 = vld.sshfl [vmem:[#allocation1 + $0x10] sm:$0xff pattern:$0x73625140] }
 0x35a   : > { %1507 = vrot.lane.b32.xlu2 %v1504_v59, %s2722_s22  ;;  %1511 = vrot.lane.b32.xlu1 %v1506_v21, %s2722_s22  ;;  %v1389_v1 = vld.sshfl [vmem:[#allocation1 + $0x8] sm:$0xff pattern:$0x73625140]  ;;  %s461_s22 = sand.u32 1, %s2061_s26  }
 0x35b   : > { %1437 = vst [vmem:[#allocation1] ss:$4 sm:$0xff] %v1303_v0 }
 0x360   : > { %1393 = vrot.lane.b32.xlu0 %v1387_v42, %s2076_s16 }
 0x362   : > { %1397 = vrot.lane.b32.xlu2 %v1391_v61, %s2076_s16  ;;  %1395 = vrot.lane.b32.xlu1 %v1389_v1, %s2076_s16  ;;  %v1440_v43 = vld.sshfl [vmem:[#allocation1 + $0x8] sm:$0xff pattern:$0x73625140]  ;;  %v1438_v48 = vld.sshfl [vmem:[#allocation1] sm:$0xff pattern:$0x73625140] }
 0x363   : > { %1484 = vst [vmem:[#allocation1 + $0x3] ss:$4 sm:$0xff] %v2554_v16  ;;  %v1426_v16 = vrot.slane %v1423_v10, 2  ;;  %s2724_s16 = smov 112  }
 0x368   : > { %1444 = vrot.lane.b32.xlu0 %v1440_v43, %s2079_s15 }
 0x36a   : > { %1442 = vrot.lane.b32.xlu2 %v1438_v48, %s2079_s15  ;;  %v1485_v57 = vld.sshfl [vmem:[#allocation1] sm:$0xff pattern:$0x73625140]  ;;  %v1489_v13 = vld.sshfl [vmem:[#allocation1 + $0x10] sm:$0xff pattern:$0x73625140] }
 0x36b   : > { %1491 = vrot.lane.b32.xlu1 %v1485_v57, %s2723_s2  ;;  %v1487_v14 = vld.sshfl [vmem:[#allocation1 + $0x8] sm:$0xff pattern:$0x73625140] }
 0x370   : > { %1495 = vrot.lane.b32.xlu0 %v1489_v13, %s2723_s2 }
 0x372   : > { %1493 = vrot.lane.b32.xlu2 %v1487_v14, %s2723_s2  ;;  %s1787_s2 = sshll.u32 %s461_s22, 3 }
 0x373   : > { %1430 = vrot.lane.b32.xlu1 %v1426_v16, %s2724_s16 }
 0x378   : > { %1428 = vrot.lane.b32.xlu0 %v1425_v38, %s2724_s16 }
 0x37a   : > { %1432 = vrot.lane.b32.xlu2 %v1427_v17, %s2724_s16  ;;  %s1875_s16 = sshll.u32 %s2178_s29, 3  ;;  %s1682_s29 = scalar_lea.sflag [#allocation6], %s461_s22 }
 0x37b   : > { %s1693_s23 = scalar_lea.hbm %s2698_s13, %s1875_s16 }
 0x37c   : > { %s1697_s30 = sshll.u32 %s1693_s23, 4  ;;  %s1698_s30 = int_to_ptr.hbm [resolvable:$true] %s1697_s30 }
 0x37d   : > { %s2017_s0 = sshra.s32 %s1698_s30, 4  ;;  %s2018_s0 = int_to_ptr.hbm [resolvable:$true] %s2017_s0 }
 0x37e   : > { %s2019_s15 = scalar_lea.hbm %s2018_s0, 8  ;;  %p2024_p3 = scmp.lt.s32.totalorder %s2018_s0, %s2698_s13 }
 0x37f   : > { %p2020_p0 = scmp.ne.s32.totalorder %s2018_s0, %s2019_s15  ;;  %p2025_p4 = scmp.lt.s32.totalorder %s2023_s24, %s2019_s15 }
 0x381   : > { %p2021_p1 = pnand %p2020_p0, %p2195_p5  ;;  %p2026_p7 = por %p2025_p4, %p2024_p3 }
 0x383   : > { %p2022_p2 = pneg %p2021_p1 }
 0x385   : > { %p2027_p8 = pnand %p2026_p7, %p2022_p2 }
 0x390   : > { %v2585_v50 = vpop.permute.xlu2 %1413 }
 0x3a4   : > { %v1461_v18 = vpop.permute.xlu2 %1460 }
 0x3aa   : > { %v1410_v19 = vpop.permute.xlu0 %1409  ;;  %v1412_v12 = vpop.permute.xlu1 %1411 }
 0x3ab   : > { %v1416_v0 = vsel %vm857_vm10, %v1412_v12, %v2585_v50  ;;  %v1415_v11 = vsel %vm857_vm10, %v1410_v19, %v1412_v12 }
 0x3ac   : > { %v1477_v62 = vpop.permute.xlu2 %1476 }
 0x3b4   : > { %v1508_v20 = vpop.permute.xlu2 %1507 }
 0x3b5   : > { %1615 = vrot.lane.b32.xlu0 %v1508_v20, %s2080_s20 }
 0x3ba   : > { %v1463_v7 = vpop.permute.xlu0 %1462 }
 0x3bb   : > { %v1465_v46 = vsel %vm923_vm0, %v1461_v18, %v1463_v7 }
 0x3bc   : > { %v1459_v15 = vpop.permute.xlu1 %1458  ;;  %v1398_v36 = vpop.permute.xlu2 %1397 }
 0x3bd   : > { %v1464_v31 = vsel %vm923_vm0, %v1459_v15, %v1461_v18  ;;  %v1523_v26 = vsel %vm1015_vm13, %v1383_v8, %v1398_v36  ;;  %v1667_v18 = vld [vmem:[%s2695_s10] sm:$0xf] }
 0x3be   : > { %v1529_v9 = vsel %vm1008_vm15, %v1523_v26, %v2585_v50 }
 0x3c2   : > { %v1479_v22 = vpop.permute.xlu0 %1478 }
 0x3c3   : > { %v1481_v60 = vsel %vm954_vm11, %v1477_v62, %v1479_v22  ;;  %v1558_v22 = vld [vmem:[%s2694_s9] sm:$0x3] }
 0x3c4   : > { %v1475_v23 = vpop.permute.xlu1 %1474  ;;  %v1443_v28 = vpop.permute.xlu2 %1442  ;;  %1852 = vmatmul.msk.bf16.vlgmr.msrb.gmra.mxu1 %vm1561_vm3, %v1558_v22  ;;  %1851 = vmatmul.msk.bf16.vlgmr.msrb.gmra.mxu0 %vm1561_vm3, %v1558_v22 }
 0x3c5   : > { %v1538_v30 = vsel %vm1015_vm13, %v1443_v28, %v1459_v15  ;;  %v1480_v33 = vsel %vm954_vm11, %v1475_v23, %v1477_v62 }
 0x3c6   : > { %v1546_v37 = vsel %vm1008_vm15, %v1538_v30, %v1475_v23 }
 0x3ca   : > { %v1510_v24 = vpop.permute.xlu0 %1509 }
 0x3cb   : > { %v1513_v40 = vsel %vm995_vm14, %v1508_v20, %v1510_v24 }
 0x3cc   : > { %v1512_v27 = vpop.permute.xlu1 %1511  ;;  %1617 = vrot.lane.b32.xlu1 %v1513_v40, %s2080_s20  ;;  %v1494_v3 = vpop.permute.xlu2 %1493 }
 0x3cd   : > { %v1514_v6 = vsel %vm995_vm14, %v1510_v24, %v1512_v27 }
 0x3ce   : > { %1619 = vrot.lane.b32.xlu2 %v1514_v6, %s2080_s20 }
 0x3d2   : > { %v1394_v29 = vpop.permute.xlu0 %1393 }
 0x3d4   : > { %v1396_v35 = vpop.permute.xlu1 %1395  ;;  %v1433_v1 = vpop.permute.xlu2 %1432 }
 0x3d5   : > { %v1400_v51 = vsel %vm709_vm9, %v1396_v35, %v1398_v36  ;;  %v1399_v43 = vsel %vm709_vm9, %v1394_v29, %v1396_v35  ;;  %v1535_v38 = vsel %vm998_vm5, %v1529_v9, %v1433_v1  ;;  %v1557_v35 = vld [vmem:[%s2693_s8] sm:$0x3] }
 0x3d6   : > { %v1520_v59 = vsel %vm1015_vm13, %v1382_v53, %v1400_v51  ;;  %v1517_v13 = vsel %vm1015_vm13, %v1381_v39, %v1399_v43 }
 0x3d7   : > { %v1527_v2 = vsel %vm1008_vm15, %v1520_v59, %v1416_v0  ;;  %v1525_v5 = vsel %vm1008_vm15, %v1517_v13, %v1415_v11 }
 0x3da   : > { %v1445_v32 = vpop.permute.xlu0 %1444 }
 0x3db   : > { %v1446_v54 = vsel %vm637_vm6, %v1443_v28, %v1445_v32  ;;  %v1544_v52 = vsel %vm1015_vm13, %v1445_v32, %v1465_v46 }
 0x3dc   : > { %v1541_v34 = vsel %vm1015_vm13, %v1446_v54, %v1464_v31  ;;  %v1550_v42 = vsel %vm1008_vm15, %v1544_v52, %v1481_v60 }
 0x3dd   : > { %v1492_v63 = vpop.permute.xlu1 %1491  ;;  %v1548_v44 = vsel %vm1008_vm15, %v1541_v34, %v1480_v33 }
 0x3de   : > { %v1497_v49 = vsel %vm973_vm12, %v1492_v63, %v1494_v3  ;;  %v1552_v45 = vsel %vm998_vm5, %v1546_v37, %v1492_v63 }
 0x3df   : > { %1609 = vrot.lane.b32.xlu0 %v1552_v45, %s2080_s20  ;;  %v1554_v47 = vsel %vm998_vm5, %v1548_v44, %v1497_v49 }
 0x3e0   : > { %1611 = vrot.lane.b32.xlu1 %v1554_v47, %s2080_s20 }
 0x3e2   : > { %v1496_v58 = vpop.permute.xlu0 %1495 }
 0x3e3   : > { %v1498_v21 = vsel %vm973_vm12, %v1494_v3, %v1496_v58 }
 0x3e4   : > { %v1556_v61 = vsel %vm998_vm5, %v1550_v42, %v1498_v21 }
 0x3e5   : > { %v1431_v48 = vpop.permute.xlu1 %1430  ;;  %1613 = vrot.lane.b32.xlu2 %v1556_v61, %s2080_s20 }
 0x3e6   : > { %v1435_v57 = vsel %vm884_vm1, %v1431_v48, %v1433_v1 }
 0x3e7   : > { %v1533_v10 = vsel %vm998_vm5, %v1527_v2, %v1435_v57 }
 0x3e8   : > { %1605 = vrot.lane.b32.xlu1 %v1533_v10, %s2080_s20 }
 0x3ea   : > { %v1429_v14 = vpop.permute.xlu0 %1428 }
 0x3eb   : > { %v1434_v16 = vsel %vm884_vm1, %v1429_v14, %v1431_v48 }
 0x3ec   : > { %v1531_v17 = vsel %vm998_vm5, %v1525_v5, %v1434_v16 }
 0x3ed   : > { %1607 = vrot.lane.b32.xlu2 %v1535_v38, %s2080_s20  ;;  %1603 = vrot.lane.b32.xlu0 %v1531_v17, %s2080_s20  ;;  %s463_s20 = scalar_lea.vmem [#allocation7], %s1787_s2 }
 0x3ee   : > { %s1695_s21 = sshll.u32 %s463_s20, 4  ;;  %s1696_s21 = int_to_ptr.vmem [resolvable:$true] %s1695_s21 }
 0x3f0   : > { %1670 = vperm.xlu1 %1942, %v1667_v18  }
 0x427   : > { %v1616_v62 = vpop.permute.xlu0 %1615 }
 0x428   : > { %v1620_v19 = vpop.permute.xlu2 %1619 }
 0x43e   : > { %v1618_v12 = vpop.permute.xlu1 %1617 }
 0x43f   : > { %v1625_v50 = vsel %vm776_vm7, %v1616_v62, %v1618_v12  ;;  %v1626_v20 = vsel %vm776_vm7, %v1618_v12, %v1620_v19  ;;  %v1614_v23 = vpop.permute.xlu2 %1613 }
 0x440   : > { %v1636_v7 = vsel %vm1015_vm13, %v1625_v50, 0  ;;  %v1639_v15 = vsel %vm1015_vm13, %v1626_v20, 0 }
 0x441   : > { %1646 = vmatpush.bf16.msrb.mxu2 %v1636_v7  ;;  %1659 = vmatpush.bf16.msrb.mxu3 %v1639_v15  ;;  %v1593_v32 = vpop.f32.mrf.mxu1  ;;  %v1580_v31 = vpop.f32.mrf.mxu0 }
 0x447   : > { %v1608_v6 = vpop.permute.xlu2 %1607 }
 0x449   : > { %v1595_v3 = vpop.f32.mrf.mxu1  ;;  %v1582_v54 = vpop.f32.mrf.mxu0 }
 0x451   : > { %v1610_v36 = vpop.permute.xlu0 %1609 }
 0x452   : > { %v1612_v24 = vpop.permute.xlu1 %1611 }
 0x453   : > { %v1623_v40 = vsel %vm776_vm7, %v1610_v36, %v1612_v24  ;;  %v1624_v27 = vsel %vm776_vm7, %v1612_v24, %v1614_v23 }
 0x454   : > { %1647 = vmatpush.bf16.msrb.mxu2 %v1623_v40  ;;  %1660 = vmatpush.bf16.msrb.mxu3 %v1624_v27 }
 0x45a   : > { %v1606_v28 = vpop.permute.xlu1 %1605 }
 0x45b   : > { %v1622_v29 = vsel %vm776_vm7, %v1606_v28, %v1608_v6 }
 0x45c   : > { %1661 = vmatpush.bf16.msrb.mxu3 %v1622_v29 }
 0x45f   : > { %1854 = vmatmul.msk.bf16.vlgmr.msrb.gmra.mxu3 %vm1631_vm4, %v1557_v35  ;;  %v1604_v4 = vpop.permute.xlu0 %1603 }
 0x460   : > { %v1621_v30 = vsel %vm776_vm7, %v1604_v4, %v1606_v28 }
 0x461   : > { %1648 = vmatpush.bf16.msrb.mxu2 %v1621_v30 }
 0x462   : > { %v1671_v37 = vpop.permute.xlu1 %1670 }
 0x464   : > { %1853 = vmatmul.msk.bf16.vlgmr.msrb.gmra.mxu2 %vm1631_vm4, %v1557_v35 }
 0x4e2   : > { %v1663_v33 = vpop.f32.mrf.mxu3 }
 0x4e3   : > { %v1664_v34 = vadd.f32 %v1663_v33, %v1593_v32 }
 0x4e5   : > { %v1674_v41 = vadd.f32 %v1671_v37, %v1664_v34 }
 0x4e7   : > { %v1650_v63 = vpop.f32.mrf.mxu2  ;;  %v1677_v25 = vrot.slane %v1674_v41, 4 }
 0x4e8   : > { %v1651_v44 = vadd.f32 %v1650_v63, %v1580_v31 }
 0x4ea   : > { %v1673_v49 = vadd.f32 %v1671_v37, %v1651_v44  ;;  %v1665_v45 = vpop.f32.mrf.mxu3 }
 0x4ec   : > { %v1678_v46 = vsel %vm1008_vm15, %v1673_v49, %v1677_v25 }
 0x4ed   : > { %1680 = vst [vmem:[%s463_s20] sm:$0xff] %v1678_v46 }
 0x4ee   : > { %2030 = shalt.err (!%p2027_p8)
}
 0x4ef   : > { %1880 = dma.vmem_to_hbm [thread:$0]  (%p2195_p5), %s1696_s21, 128, %s1698_s30, %s1682_s29   ;;  %v1652_v47 = vpop.f32.mrf.mxu2 }
 0x4f0 PF: > { %p1892_p9 = scmp.ge.s32.totalorder %s2069_s28, 2  ;;  %s1709_s22 = sand.u32 1, %s2057_s25  }
 0x4f1   : > { %s1710_s20 = scalar_lea.sflag [#allocation6], %s1709_s22 }
 0x4f2   : > { %p1887_p10 = pnand %p1892_p9, %p2199_p6 }
 0x4f4   : > { %p1888_p11 = pneg %p1887_p10 }
 0x4f6   : > { %2052 = dma.done.wait (%p1888_p11), %s1710_s20, 128  }
 0x4f7   : > { %2054 = vsyncadd (%p1888_p11), %s1710_s20, 4294967168  ;;  %p24_p12 = scmp.ge.s32.totalorder %s2182_s14, 4   ;;  %s2725_s25 = smov %s2061_s26 }
 0x4f8   : > { %s2726_s26 = smov %s2065_s27  ;;  %s2727_s27 = smov %s2193_s17 }
 0x4f9   : > { %s2728_s28 = smov %s2182_s14  ;;  %26 = sbr.rel (!%p24_p12) target bundleno = 8 (0x8), region = 123 }
 0x4fe   :  { %1716 = vsyncpa [#allocation5], 1 }
 0x4ff   :  { %1718 = vsyncpa [#allocation5 + $0x1], 1 }
 0x500   :  { %1719 = vsyncpa [#allocation6], 1 }
 0x501   :  { %1721 = vsyncpa [#allocation6 + $0x1], 1 }

</bundles_post_ra>
